<compile_context>
chip_gen: v5e
topology: v5e:2x2
jax: 0.10.0
libtpu: 0.0.40
codegen_flags: <defaults>
</compile_context>

<pallas_src>
import math

import jax
import jax.numpy as jnp
from jax.experimental import pallas as pl
from jax.experimental.pallas import tpu as pltpu

IN_DIM = 52 * 3 + 16 * 4 + 4 * 4  # 236
DIMS = [IN_DIM, 256, 128, 64, 64, 64, 64, 64, 64, 52]
N_LAYERS = len(DIMS) - 1          # 9
OUT_DIM = DIMS[-1]                # 52
OUT_PAD = 128                     # lane-dense output width (sliced to 52 outside)


def _round_up(x, m):
    return ((x + m - 1) // m) * m


def _mlp_kernel(x_ref, *refs):
    """Fused 9-layer MLP on one batch tile.

    refs = (w1, b1, ..., w9, b9, o_ref). Weights are bf16 [in, out] and stay
    resident in VMEM across all grid steps (constant index maps); biases are
    f32. Matmuls run bf16 x bf16 -> f32 on the MXU; the running activation is
    re-cast to bf16 only at each MXU input.
    """
    o_ref = refs[-1]
    wb = refs[:-1]

    h = x_ref[...]  # already bf16 (cast once in the wrapper)

    for layer in range(N_LAYERS):
        w_ref = wb[2 * layer]
        b_ref = wb[2 * layer + 1]
        acc = jnp.dot(h, w_ref[...], preferred_element_type=jnp.float32)
        acc = acc + b_ref[...]                 # f32 bias add (broadcast)
        if layer < N_LAYERS - 1:
            h = jnp.maximum(acc, 0.0).astype(jnp.bfloat16)   # ReLU, back to bf16
        else:
            o_ref[...] = acc.astype(o_ref.dtype)             # bf16 lane-dense store


def _prepare_params(params):
    """Cast weights to bf16 once; zero-pad the last layer's columns 52 -> 128."""
    prepared = []
    for i, (w, b) in enumerate(params):
        wp = w.astype(jnp.bfloat16)
        bp = b.astype(jnp.float32)
        if i == N_LAYERS - 1:
            pad = OUT_PAD - wp.shape[1]
            wp = jnp.pad(wp, ((0, 0), (0, pad)))
            bp = jnp.pad(bp, ((0, 0), (0, pad)))
        prepared.append((wp, bp))
    return prepared


def _make_in_specs(prepared, tb, buffered_weights):
    specs = [pl.BlockSpec((tb, IN_DIM), lambda i: (i, 0))]
    for w, b in prepared:
        if buffered_weights:
            # Constant index map -> block never changes; single buffer is enough.
            specs.append(pl.BlockSpec(w.shape, lambda i: (0, 0),
                                      pipeline_mode=pl.Buffered(1)))
            specs.append(pl.BlockSpec(b.shape, lambda i: (0, 0),
                                      pipeline_mode=pl.Buffered(1)))
        else:
            specs.append(pl.BlockSpec(w.shape, lambda i: (0, 0)))
            specs.append(pl.BlockSpec(b.shape, lambda i: (0, 0)))
    return specs


def nn_second_forward(x, params, *, block_b=2048):
    """x: [B, 236] (f32 or bf16). params: list of 9 (W[in,out] f32, b[1,out] f32).

    Returns f32 [B, 52].
    """
    B = x.shape[0]
    assert x.shape[1] == IN_DIM, x.shape

    # Tile selection: at least 2 grid steps (so the "parallel" batch axis can
    # shard across both v7x TensorCores), padding capped at <16 rows, and TB a
    # multiple of 16 so bf16 activations keep fully packed sublanes.
    n_steps = max(2, math.ceil(B / block_b))
    TB = _round_up(max(1, math.ceil(B / n_steps)), 16)
    Bp = _round_up(B, TB)

    # Stream x as bf16: halves input HBM traffic and the x VMEM tile.
    x = x.astype(jnp.bfloat16)
    if Bp != B:
        x = jnp.pad(x, ((0, Bp - B), (0, 0)))

    prepared = _prepare_params(params)
    flat = [x]
    for w, b in prepared:
        flat.extend([w, b])

    flops_per_row = 2 * sum(DIMS[i] * DIMS[i + 1] for i in range(N_LAYERS))
    weight_bytes = sum(int(w.size) * w.dtype.itemsize + int(b.size) * b.dtype.itemsize
                       for w, b in prepared)
    cost = pl.CostEstimate(
        flops=flops_per_row * Bp,
        transcendentals=0,
        # bf16 x in, bf16 128-wide out, plus resident weights/biases (read once).
        bytes_accessed=Bp * (IN_DIM * 2 + OUT_PAD * 2) + weight_bytes,
    )

    def _run(buffered_weights):
        call = pl.pallas_call(
            _mlp_kernel,
            out_shape=jax.ShapeDtypeStruct((Bp, OUT_PAD), jnp.bfloat16),
            grid=(Bp // TB,),
            in_specs=_make_in_specs(prepared, TB, buffered_weights),
            out_specs=pl.BlockSpec((TB, OUT_PAD), lambda i: (i, 0)),
            compiler_params=pltpu.CompilerParams(
                dimension_semantics=("parallel",),
                vmem_limit_bytes=48 * 1024 * 1024,
            ),
            cost_estimate=cost,
        )
        return call(*flat)

    try:
        out = _run(True)
    except Exception:
        # Fallback if Buffered(1) pipeline mode is rejected by this jax version;
        # weights then just get default double-buffering (still resident).
        out = _run(False)

    return out[:B, :OUT_DIM].astype(jnp.float32)


def init_params(key):
    """Deterministic init mirroring nn.Linear default uniform(-1/sqrt(fan_in), ...)."""
    params = []
    for i in range(N_LAYERS):
        fan_in, fan_out = DIMS[i], DIMS[i + 1]
        key, kw, kb = jax.random.split(key, 3)
        bound = 1.0 / (fan_in ** 0.5)
        # Stored as [in, out] (PyTorch weight transposed) so the kernel is x @ W.
        w = jax.random.uniform(kw, (fan_in, fan_out), jnp.float32, -bound, bound)
        b = jax.random.uniform(kb, (1, fan_out), jnp.float32, -bound, bound)
        params.append((w, b))
    return params


def reference_forward(x, params):
    # Same bf16-input / f32-accumulate math as the kernel. NOTE: this validates
    # self-consistency of the kernel, not bit-parity with a pure-f32 PyTorch
    # NN_Second (bf16 weights/activations deviate from f32 by ~2^-8 relative).
    h = x
    for i, (w, b) in enumerate(params):
        h = jnp.dot(h.astype(jnp.bfloat16), w.astype(jnp.bfloat16),
                    preferred_element_type=jnp.float32) + b
        if i < N_LAYERS - 1:
            h = jnp.maximum(h, 0.0)
    return h


if __name__ == "__main__":
    key = jax.random.PRNGKey(0)
    key, kx = jax.random.split(key)
    B = 8
    x = jax.random.normal(kx, (B, IN_DIM), jnp.float32)

    params = init_params(key)

    out = nn_second_forward(x, params)
    out = jax.block_until_ready(out)

    ref = reference_forward(x, params)
    # Kernel output went through a bf16 store; round the reference the same way.
    ref = ref.astype(jnp.bfloat16).astype(jnp.float32)

    assert out.shape == (B, OUT_DIM), out.shape
    assert jnp.allclose(out, ref, atol=2e-2, rtol=2e-2), "mismatch vs reference"

    print("KERNEL_OK")
</pallas_src>

<mosaic_0001>
module attributes {stable_mosaic.version = 11 : i64} {
  func.func @_mlp_kernel(%arg0: i32, %arg1: memref<16x236xbf16, #tpu.memory_space<vmem>>, %arg2: memref<236x256xbf16, #tpu.memory_space<vmem>>, %arg3: memref<1x256xf32, #tpu.memory_space<vmem>>, %arg4: memref<256x128xbf16, #tpu.memory_space<vmem>>, %arg5: memref<1x128xf32, #tpu.memory_space<vmem>>, %arg6: memref<128x64xbf16, #tpu.memory_space<vmem>>, %arg7: memref<1x64xf32, #tpu.memory_space<vmem>>, %arg8: memref<64x64xbf16, #tpu.memory_space<vmem>>, %arg9: memref<1x64xf32, #tpu.memory_space<vmem>>, %arg10: memref<64x64xbf16, #tpu.memory_space<vmem>>, %arg11: memref<1x64xf32, #tpu.memory_space<vmem>>, %arg12: memref<64x64xbf16, #tpu.memory_space<vmem>>, %arg13: memref<1x64xf32, #tpu.memory_space<vmem>>, %arg14: memref<64x64xbf16, #tpu.memory_space<vmem>>, %arg15: memref<1x64xf32, #tpu.memory_space<vmem>>, %arg16: memref<64x64xbf16, #tpu.memory_space<vmem>>, %arg17: memref<1x64xf32, #tpu.memory_space<vmem>>, %arg18: memref<64x128xbf16, #tpu.memory_space<vmem>>, %arg19: memref<1x128xf32, #tpu.memory_space<vmem>>, %arg20: memref<16x128xbf16, #tpu.memory_space<vmem>>) attributes {dimension_semantics = [#tpu.dimension_semantics<parallel>], iteration_bounds = array<i64: 1>, scalar_prefetch = 0 : i64, scratch_operands = 0 : i64, tpu.core_type = #tpu.core_type<tc>, window_params = [{transform_indices = @transform_0, window_bounds = array<i64: 16, 236>}, {pipeline_mode = #tpu.pipeline_mode<synchronous>, transform_indices = @transform_1, window_bounds = array<i64: 236, 256>}, {pipeline_mode = #tpu.pipeline_mode<synchronous>, transform_indices = @transform_2, window_bounds = array<i64: 1, 256>}, {pipeline_mode = #tpu.pipeline_mode<synchronous>, transform_indices = @transform_3, window_bounds = array<i64: 256, 128>}, {pipeline_mode = #tpu.pipeline_mode<synchronous>, transform_indices = @transform_4, window_bounds = array<i64: 1, 128>}, {pipeline_mode = #tpu.pipeline_mode<synchronous>, transform_indices = @transform_5, window_bounds = array<i64: 128, 64>}, {pipeline_mode = #tpu.pipeline_mode<synchronous>, transform_indices = @transform_6, window_bounds = array<i64: 1, 64>}, {pipeline_mode = #tpu.pipeline_mode<synchronous>, transform_indices = @transform_7, window_bounds = array<i64: 64, 64>}, {pipeline_mode = #tpu.pipeline_mode<synchronous>, transform_indices = @transform_8, window_bounds = array<i64: 1, 64>}, {pipeline_mode = #tpu.pipeline_mode<synchronous>, transform_indices = @transform_9, window_bounds = array<i64: 64, 64>}, {pipeline_mode = #tpu.pipeline_mode<synchronous>, transform_indices = @transform_10, window_bounds = array<i64: 1, 64>}, {pipeline_mode = #tpu.pipeline_mode<synchronous>, transform_indices = @transform_11, window_bounds = array<i64: 64, 64>}, {pipeline_mode = #tpu.pipeline_mode<synchronous>, transform_indices = @transform_12, window_bounds = array<i64: 1, 64>}, {pipeline_mode = #tpu.pipeline_mode<synchronous>, transform_indices = @transform_13, window_bounds = array<i64: 64, 64>}, {pipeline_mode = #tpu.pipeline_mode<synchronous>, transform_indices = @transform_14, window_bounds = array<i64: 1, 64>}, {pipeline_mode = #tpu.pipeline_mode<synchronous>, transform_indices = @transform_15, window_bounds = array<i64: 64, 64>}, {pipeline_mode = #tpu.pipeline_mode<synchronous>, transform_indices = @transform_16, window_bounds = array<i64: 1, 64>}, {pipeline_mode = #tpu.pipeline_mode<synchronous>, transform_indices = @transform_17, window_bounds = array<i64: 64, 128>}, {pipeline_mode = #tpu.pipeline_mode<synchronous>, transform_indices = @transform_18, window_bounds = array<i64: 1, 128>}, {transform_indices = @transform_19, window_bounds = array<i64: 16, 128>}]} {
    %c0 = arith.constant 0 : index
    %c0_0 = arith.constant 0 : index
    %0 = vector.load %arg1[%c0, %c0_0] : memref<16x236xbf16, #tpu.memory_space<vmem>>, vector<16x236xbf16>
    %c0_1 = arith.constant 0 : index
    %c0_2 = arith.constant 0 : index
    %1 = vector.load %arg2[%c0_1, %c0_2] : memref<236x256xbf16, #tpu.memory_space<vmem>>, vector<236x256xbf16>
    %cst = arith.constant dense<0.000000e+00> : vector<16x256xf32>
    %2 = tpu.matmul %0, %1, %cst {dimension_numbers = #tpu.dot_dimension_numbers<[1], [0], [0], [1], [0, 0, 1, 1], [], []>} : vector<16x236xbf16>, vector<236x256xbf16>, vector<16x256xf32> -> vector<16x256xf32>
    %c0_3 = arith.constant 0 : index
    %c0_4 = arith.constant 0 : index
    %3 = vector.load %arg3[%c0_3, %c0_4] : memref<1x256xf32, #tpu.memory_space<vmem>>, vector<1x256xf32>
    %4 = vector.broadcast %3 : vector<1x256xf32> to vector<16x256xf32>
    %5 = arith.addf %2, %4 : vector<16x256xf32>
    %cst_5 = arith.constant 0.000000e+00 : f32
    %6 = vector.broadcast %cst_5 : f32 to vector<16x256xf32>
    %7 = arith.maximumf %5, %6 : vector<16x256xf32>
    %8 = arith.truncf %7 : vector<16x256xf32> to vector<16x256xbf16>
    %c0_6 = arith.constant 0 : index
    %c0_7 = arith.constant 0 : index
    %9 = vector.load %arg4[%c0_6, %c0_7] : memref<256x128xbf16, #tpu.memory_space<vmem>>, vector<256x128xbf16>
    %cst_8 = arith.constant dense<0.000000e+00> : vector<16x128xf32>
    %10 = tpu.matmul %8, %9, %cst_8 {dimension_numbers = #tpu.dot_dimension_numbers<[1], [0], [0], [1], [0, 0, 1, 1], [], []>} : vector<16x256xbf16>, vector<256x128xbf16>, vector<16x128xf32> -> vector<16x128xf32>
    %c0_9 = arith.constant 0 : index
    %c0_10 = arith.constant 0 : index
    %11 = vector.load %arg5[%c0_9, %c0_10] : memref<1x128xf32, #tpu.memory_space<vmem>>, vector<1x128xf32>
    %12 = vector.broadcast %11 : vector<1x128xf32> to vector<16x128xf32>
    %13 = arith.addf %10, %12 : vector<16x128xf32>
    %cst_11 = arith.constant 0.000000e+00 : f32
    %14 = vector.broadcast %cst_11 : f32 to vector<16x128xf32>
    %15 = arith.maximumf %13, %14 : vector<16x128xf32>
    %16 = arith.truncf %15 : vector<16x128xf32> to vector<16x128xbf16>
    %c0_12 = arith.constant 0 : index
    %c0_13 = arith.constant 0 : index
    %17 = vector.load %arg6[%c0_12, %c0_13] : memref<128x64xbf16, #tpu.memory_space<vmem>>, vector<128x64xbf16>
    %cst_14 = arith.constant dense<0.000000e+00> : vector<16x64xf32>
    %18 = tpu.matmul %16, %17, %cst_14 {dimension_numbers = #tpu.dot_dimension_numbers<[1], [0], [0], [1], [0, 0, 1, 1], [], []>} : vector<16x128xbf16>, vector<128x64xbf16>, vector<16x64xf32> -> vector<16x64xf32>
    %c0_15 = arith.constant 0 : index
    %c0_16 = arith.constant 0 : index
    %19 = vector.load %arg7[%c0_15, %c0_16] : memref<1x64xf32, #tpu.memory_space<vmem>>, vector<1x64xf32>
    %20 = vector.broadcast %19 : vector<1x64xf32> to vector<16x64xf32>
    %21 = arith.addf %18, %20 : vector<16x64xf32>
    %cst_17 = arith.constant 0.000000e+00 : f32
    %22 = vector.broadcast %cst_17 : f32 to vector<16x64xf32>
    %23 = arith.maximumf %21, %22 : vector<16x64xf32>
    %24 = arith.truncf %23 : vector<16x64xf32> to vector<16x64xbf16>
    %c0_18 = arith.constant 0 : index
    %c0_19 = arith.constant 0 : index
    %25 = vector.load %arg8[%c0_18, %c0_19] : memref<64x64xbf16, #tpu.memory_space<vmem>>, vector<64x64xbf16>
    %cst_20 = arith.constant dense<0.000000e+00> : vector<16x64xf32>
    %26 = tpu.matmul %24, %25, %cst_20 {dimension_numbers = #tpu.dot_dimension_numbers<[1], [0], [0], [1], [0, 0, 1, 1], [], []>} : vector<16x64xbf16>, vector<64x64xbf16>, vector<16x64xf32> -> vector<16x64xf32>
    %c0_21 = arith.constant 0 : index
    %c0_22 = arith.constant 0 : index
    %27 = vector.load %arg9[%c0_21, %c0_22] : memref<1x64xf32, #tpu.memory_space<vmem>>, vector<1x64xf32>
    %28 = vector.broadcast %27 : vector<1x64xf32> to vector<16x64xf32>
    %29 = arith.addf %26, %28 : vector<16x64xf32>
    %cst_23 = arith.constant 0.000000e+00 : f32
    %30 = vector.broadcast %cst_23 : f32 to vector<16x64xf32>
    %31 = arith.maximumf %29, %30 : vector<16x64xf32>
    %32 = arith.truncf %31 : vector<16x64xf32> to vector<16x64xbf16>
    %c0_24 = arith.constant 0 : index
    %c0_25 = arith.constant 0 : index
    %33 = vector.load %arg10[%c0_24, %c0_25] : memref<64x64xbf16, #tpu.memory_space<vmem>>, vector<64x64xbf16>
    %cst_26 = arith.constant dense<0.000000e+00> : vector<16x64xf32>
    %34 = tpu.matmul %32, %33, %cst_26 {dimension_numbers = #tpu.dot_dimension_numbers<[1], [0], [0], [1], [0, 0, 1, 1], [], []>} : vector<16x64xbf16>, vector<64x64xbf16>, vector<16x64xf32> -> vector<16x64xf32>
    %c0_27 = arith.constant 0 : index
    %c0_28 = arith.constant 0 : index
    %35 = vector.load %arg11[%c0_27, %c0_28] : memref<1x64xf32, #tpu.memory_space<vmem>>, vector<1x64xf32>
    %36 = vector.broadcast %35 : vector<1x64xf32> to vector<16x64xf32>
    %37 = arith.addf %34, %36 : vector<16x64xf32>
    %cst_29 = arith.constant 0.000000e+00 : f32
    %38 = vector.broadcast %cst_29 : f32 to vector<16x64xf32>
    %39 = arith.maximumf %37, %38 : vector<16x64xf32>
    %40 = arith.truncf %39 : vector<16x64xf32> to vector<16x64xbf16>
    %c0_30 = arith.constant 0 : index
    %c0_31 = arith.constant 0 : index
    %41 = vector.load %arg12[%c0_30, %c0_31] : memref<64x64xbf16, #tpu.memory_space<vmem>>, vector<64x64xbf16>
    %cst_32 = arith.constant dense<0.000000e+00> : vector<16x64xf32>
    %42 = tpu.matmul %40, %41, %cst_32 {dimension_numbers = #tpu.dot_dimension_numbers<[1], [0], [0], [1], [0, 0, 1, 1], [], []>} : vector<16x64xbf16>, vector<64x64xbf16>, vector<16x64xf32> -> vector<16x64xf32>
    %c0_33 = arith.constant 0 : index
    %c0_34 = arith.constant 0 : index
    %43 = vector.load %arg13[%c0_33, %c0_34] : memref<1x64xf32, #tpu.memory_space<vmem>>, vector<1x64xf32>
    %44 = vector.broadcast %43 : vector<1x64xf32> to vector<16x64xf32>
    %45 = arith.addf %42, %44 : vector<16x64xf32>
    %cst_35 = arith.constant 0.000000e+00 : f32
    %46 = vector.broadcast %cst_35 : f32 to vector<16x64xf32>
    %47 = arith.maximumf %45, %46 : vector<16x64xf32>
    %48 = arith.truncf %47 : vector<16x64xf32> to vector<16x64xbf16>
    %c0_36 = arith.constant 0 : index
    %c0_37 = arith.constant 0 : index
    %49 = vector.load %arg14[%c0_36, %c0_37] : memref<64x64xbf16, #tpu.memory_space<vmem>>, vector<64x64xbf16>
    %cst_38 = arith.constant dense<0.000000e+00> : vector<16x64xf32>
    %50 = tpu.matmul %48, %49, %cst_38 {dimension_numbers = #tpu.dot_dimension_numbers<[1], [0], [0], [1], [0, 0, 1, 1], [], []>} : vector<16x64xbf16>, vector<64x64xbf16>, vector<16x64xf32> -> vector<16x64xf32>
    %c0_39 = arith.constant 0 : index
    %c0_40 = arith.constant 0 : index
    %51 = vector.load %arg15[%c0_39, %c0_40] : memref<1x64xf32, #tpu.memory_space<vmem>>, vector<1x64xf32>
    %52 = vector.broadcast %51 : vector<1x64xf32> to vector<16x64xf32>
    %53 = arith.addf %50, %52 : vector<16x64xf32>
    %cst_41 = arith.constant 0.000000e+00 : f32
    %54 = vector.broadcast %cst_41 : f32 to vector<16x64xf32>
    %55 = arith.maximumf %53, %54 : vector<16x64xf32>
    %56 = arith.truncf %55 : vector<16x64xf32> to vector<16x64xbf16>
    %c0_42 = arith.constant 0 : index
    %c0_43 = arith.constant 0 : index
    %57 = vector.load %arg16[%c0_42, %c0_43] : memref<64x64xbf16, #tpu.memory_space<vmem>>, vector<64x64xbf16>
    %cst_44 = arith.constant dense<0.000000e+00> : vector<16x64xf32>
    %58 = tpu.matmul %56, %57, %cst_44 {dimension_numbers = #tpu.dot_dimension_numbers<[1], [0], [0], [1], [0, 0, 1, 1], [], []>} : vector<16x64xbf16>, vector<64x64xbf16>, vector<16x64xf32> -> vector<16x64xf32>
    %c0_45 = arith.constant 0 : index
    %c0_46 = arith.constant 0 : index
    %59 = vector.load %arg17[%c0_45, %c0_46] : memref<1x64xf32, #tpu.memory_space<vmem>>, vector<1x64xf32>
    %60 = vector.broadcast %59 : vector<1x64xf32> to vector<16x64xf32>
    %61 = arith.addf %58, %60 : vector<16x64xf32>
    %cst_47 = arith.constant 0.000000e+00 : f32
    %62 = vector.broadcast %cst_47 : f32 to vector<16x64xf32>
    %63 = arith.maximumf %61, %62 : vector<16x64xf32>
    %64 = arith.truncf %63 : vector<16x64xf32> to vector<16x64xbf16>
    %c0_48 = arith.constant 0 : index
    %c0_49 = arith.constant 0 : index
    %65 = vector.load %arg18[%c0_48, %c0_49] : memref<64x128xbf16, #tpu.memory_space<vmem>>, vector<64x128xbf16>
    %cst_50 = arith.constant dense<0.000000e+00> : vector<16x128xf32>
    %66 = tpu.matmul %64, %65, %cst_50 {dimension_numbers = #tpu.dot_dimension_numbers<[1], [0], [0], [1], [0, 0, 1, 1], [], []>} : vector<16x64xbf16>, vector<64x128xbf16>, vector<16x128xf32> -> vector<16x128xf32>
    %c0_51 = arith.constant 0 : index
    %c0_52 = arith.constant 0 : index
    %67 = vector.load %arg19[%c0_51, %c0_52] : memref<1x128xf32, #tpu.memory_space<vmem>>, vector<1x128xf32>
    %68 = vector.broadcast %67 : vector<1x128xf32> to vector<16x128xf32>
    %69 = arith.addf %66, %68 : vector<16x128xf32>
    %70 = arith.truncf %69 : vector<16x128xf32> to vector<16x128xbf16>
    %c0_53 = arith.constant 0 : index
    %c0_54 = arith.constant 0 : index
    %71 = vector.load %arg20[%c0_53, %c0_54] : memref<16x128xbf16, #tpu.memory_space<vmem>>, vector<16x128xbf16>
    tpu.vector_store %arg20[%c0_53, %c0_54], %70 {strides = array<i32>} : memref<16x128xbf16, #tpu.memory_space<vmem>>, vector<16x128xbf16>,
    return
  }
  func.func @transform_0(%arg0: i32) -> (i32, i32) {
    %c0_i32 = arith.constant 0 : i32
    %c0_i32_0 = arith.constant 0 : i32
    return %arg0, %c0_i32 : i32, i32
  }
  func.func @transform_1(%arg0: i32) -> (i32, i32) {
    %c0_i32 = arith.constant 0 : i32
    %c0_i32_0 = arith.constant 0 : i32
    %c0_i32_1 = arith.constant 0 : i32
    return %c0_i32, %c0_i32_0 : i32, i32
  }
  func.func @transform_2(%arg0: i32) -> (i32, i32) {
    %c0_i32 = arith.constant 0 : i32
    %c0_i32_0 = arith.constant 0 : i32
    %c0_i32_1 = arith.constant 0 : i32
    return %c0_i32, %c0_i32_0 : i32, i32
  }
  func.func @transform_3(%arg0: i32) -> (i32, i32) {
    %c0_i32 = arith.constant 0 : i32
    %c0_i32_0 = arith.constant 0 : i32
    %c0_i32_1 = arith.constant 0 : i32
    return %c0_i32, %c0_i32_0 : i32, i32
  }
  func.func @transform_4(%arg0: i32) -> (i32, i32) {
    %c0_i32 = arith.constant 0 : i32
    %c0_i32_0 = arith.constant 0 : i32
    %c0_i32_1 = arith.constant 0 : i32
    return %c0_i32, %c0_i32_0 : i32, i32
  }
  func.func @transform_5(%arg0: i32) -> (i32, i32) {
    %c0_i32 = arith.constant 0 : i32
    %c0_i32_0 = arith.constant 0 : i32
    %c0_i32_1 = arith.constant 0 : i32
    return %c0_i32, %c0_i32_0 : i32, i32
  }
  func.func @transform_6(%arg0: i32) -> (i32, i32) {
    %c0_i32 = arith.constant 0 : i32
    %c0_i32_0 = arith.constant 0 : i32
    %c0_i32_1 = arith.constant 0 : i32
    return %c0_i32, %c0_i32_0 : i32, i32
  }
  func.func @transform_7(%arg0: i32) -> (i32, i32) {
    %c0_i32 = arith.constant 0 : i32
    %c0_i32_0 = arith.constant 0 : i32
    %c0_i32_1 = arith.constant 0 : i32
    return %c0_i32, %c0_i32_0 : i32, i32
  }
  func.func @transform_8(%arg0: i32) -> (i32, i32) {
    %c0_i32 = arith.constant 0 : i32
    %c0_i32_0 = arith.constant 0 : i32
    %c0_i32_1 = arith.constant 0 : i32
    return %c0_i32, %c0_i32_0 : i32, i32
  }
  func.func @transform_9(%arg0: i32) -> (i32, i32) {
    %c0_i32 = arith.constant 0 : i32
    %c0_i32_0 = arith.constant 0 : i32
    %c0_i32_1 = arith.constant 0 : i32
    return %c0_i32, %c0_i32_0 : i32, i32
  }
  func.func @transform_10(%arg0: i32) -> (i32, i32) {
    %c0_i32 = arith.constant 0 : i32
    %c0_i32_0 = arith.constant 0 : i32
    %c0_i32_1 = arith.constant 0 : i32
    return %c0_i32, %c0_i32_0 : i32, i32
  }
  func.func @transform_11(%arg0: i32) -> (i32, i32) {
    %c0_i32 = arith.constant 0 : i32
    %c0_i32_0 = arith.constant 0 : i32
    %c0_i32_1 = arith.constant 0 : i32
    return %c0_i32, %c0_i32_0 : i32, i32
  }
  func.func @transform_12(%arg0: i32) -> (i32, i32) {
    %c0_i32 = arith.constant 0 : i32
    %c0_i32_0 = arith.constant 0 : i32
    %c0_i32_1 = arith.constant 0 : i32
    return %c0_i32, %c0_i32_0 : i32, i32
  }
  func.func @transform_13(%arg0: i32) -> (i32, i32) {
    %c0_i32 = arith.constant 0 : i32
    %c0_i32_0 = arith.constant 0 : i32
    %c0_i32_1 = arith.constant 0 : i32
    return %c0_i32, %c0_i32_0 : i32, i32
  }
  func.func @transform_14(%arg0: i32) -> (i32, i32) {
    %c0_i32 = arith.constant 0 : i32
    %c0_i32_0 = arith.constant 0 : i32
    %c0_i32_1 = arith.constant 0 : i32
    return %c0_i32, %c0_i32_0 : i32, i32
  }
  func.func @transform_15(%arg0: i32) -> (i32, i32) {
    %c0_i32 = arith.constant 0 : i32
    %c0_i32_0 = arith.constant 0 : i32
    %c0_i32_1 = arith.constant 0 : i32
    return %c0_i32, %c0_i32_0 : i32, i32
  }
  func.func @transform_16(%arg0: i32) -> (i32, i32) {
    %c0_i32 = arith.constant 0 : i32
    %c0_i32_0 = arith.constant 0 : i32
    %c0_i32_1 = arith.constant 0 : i32
    return %c0_i32, %c0_i32_0 : i32, i32
  }
  func.func @transform_17(%arg0: i32) -> (i32, i32) {
    %c0_i32 = arith.constant 0 : i32
    %c0_i32_0 = arith.constant 0 : i32
    %c0_i32_1 = arith.constant 0 : i32
    return %c0_i32, %c0_i32_0 : i32, i32
  }
  func.func @transform_18(%arg0: i32) -> (i32, i32) {
    %c0_i32 = arith.constant 0 : i32
    %c0_i32_0 = arith.constant 0 : i32
    %c0_i32_1 = arith.constant 0 : i32
    return %c0_i32, %c0_i32_0 : i32, i32
  }
  func.func @transform_19(%arg0: i32) -> (i32, i32) {
    %c0_i32 = arith.constant 0 : i32
    %c0_i32_0 = arith.constant 0 : i32
    return %arg0, %c0_i32 : i32, i32
  }
}

module attributes {stable_mosaic.version = 11 : i64} {
  func.func @_mlp_kernel(%arg0: i32, %arg1: memref<16x236xbf16, #tpu.memory_space<vmem>>, %arg2: memref<236x256xbf16, #tpu.memory_space<vmem>>, %arg3: memref<1x256xf32, #tpu.memory_space<vmem>>, %arg4: memref<256x128xbf16, #tpu.memory_space<vmem>>, %arg5: memref<1x128xf32, #tpu.memory_space<vmem>>, %arg6: memref<128x64xbf16, #tpu.memory_space<vmem>>, %arg7: memref<1x64xf32, #tpu.memory_space<vmem>>, %arg8: memref<64x64xbf16, #tpu.memory_space<vmem>>, %arg9: memref<1x64xf32, #tpu.memory_space<vmem>>, %arg10: memref<64x64xbf16, #tpu.memory_space<vmem>>, %arg11: memref<1x64xf32, #tpu.memory_space<vmem>>, %arg12: memref<64x64xbf16, #tpu.memory_space<vmem>>, %arg13: memref<1x64xf32, #tpu.memory_space<vmem>>, %arg14: memref<64x64xbf16, #tpu.memory_space<vmem>>, %arg15: memref<1x64xf32, #tpu.memory_space<vmem>>, %arg16: memref<64x64xbf16, #tpu.memory_space<vmem>>, %arg17: memref<1x64xf32, #tpu.memory_space<vmem>>, %arg18: memref<64x128xbf16, #tpu.memory_space<vmem>>, %arg19: memref<1x128xf32, #tpu.memory_space<vmem>>, %arg20: memref<16x128xbf16, #tpu.memory_space<vmem>>) attributes {dimension_semantics = [#tpu.dimension_semantics<parallel>], iteration_bounds = array<i64: 1>, scalar_prefetch = 0 : i64, scratch_operands = 0 : i64, tpu.core_type = #tpu.core_type<tc>, window_params = [{transform_indices = @transform_0, window_bounds = array<i64: 16, 236>}, {pipeline_mode = #tpu.pipeline_mode<synchronous>, transform_indices = @transform_1, window_bounds = array<i64: 236, 256>}, {pipeline_mode = #tpu.pipeline_mode<synchronous>, transform_indices = @transform_2, window_bounds = array<i64: 1, 256>}, {pipeline_mode = #tpu.pipeline_mode<synchronous>, transform_indices = @transform_3, window_bounds = array<i64: 256, 128>}, {pipeline_mode = #tpu.pipeline_mode<synchronous>, transform_indices = @transform_4, window_bounds = array<i64: 1, 128>}, {pipeline_mode = #tpu.pipeline_mode<synchronous>, transform_indices = @transform_5, window_bounds = array<i64: 128, 64>}, {pipeline_mode = #tpu.pipeline_mode<synchronous>, transform_indices = @transform_6, window_bounds = array<i64: 1, 64>}, {pipeline_mode = #tpu.pipeline_mode<synchronous>, transform_indices = @transform_7, window_bounds = array<i64: 64, 64>}, {pipeline_mode = #tpu.pipeline_mode<synchronous>, transform_indices = @transform_8, window_bounds = array<i64: 1, 64>}, {pipeline_mode = #tpu.pipeline_mode<synchronous>, transform_indices = @transform_9, window_bounds = array<i64: 64, 64>}, {pipeline_mode = #tpu.pipeline_mode<synchronous>, transform_indices = @transform_10, window_bounds = array<i64: 1, 64>}, {pipeline_mode = #tpu.pipeline_mode<synchronous>, transform_indices = @transform_11, window_bounds = array<i64: 64, 64>}, {pipeline_mode = #tpu.pipeline_mode<synchronous>, transform_indices = @transform_12, window_bounds = array<i64: 1, 64>}, {pipeline_mode = #tpu.pipeline_mode<synchronous>, transform_indices = @transform_13, window_bounds = array<i64: 64, 64>}, {pipeline_mode = #tpu.pipeline_mode<synchronous>, transform_indices = @transform_14, window_bounds = array<i64: 1, 64>}, {pipeline_mode = #tpu.pipeline_mode<synchronous>, transform_indices = @transform_15, window_bounds = array<i64: 64, 64>}, {pipeline_mode = #tpu.pipeline_mode<synchronous>, transform_indices = @transform_16, window_bounds = array<i64: 1, 64>}, {pipeline_mode = #tpu.pipeline_mode<synchronous>, transform_indices = @transform_17, window_bounds = array<i64: 64, 128>}, {pipeline_mode = #tpu.pipeline_mode<synchronous>, transform_indices = @transform_18, window_bounds = array<i64: 1, 128>}, {transform_indices = @transform_19, window_bounds = array<i64: 16, 128>}]} {
    %c0 = arith.constant 0 : index
    %c0_0 = arith.constant 0 : index
    %0 = vector.load %arg1[%c0, %c0_0] : memref<16x236xbf16, #tpu.memory_space<vmem>>, vector<16x236xbf16>
    %c0_1 = arith.constant 0 : index
    %c0_2 = arith.constant 0 : index
    %1 = vector.load %arg2[%c0_1, %c0_2] : memref<236x256xbf16, #tpu.memory_space<vmem>>, vector<236x256xbf16>
    %cst = arith.constant dense<0.000000e+00> : vector<16x256xf32>
    %2 = tpu.matmul %0, %1, %cst {dimension_numbers = #tpu.dot_dimension_numbers<[1], [0], [0], [1], [0, 0, 1, 1], [], []>} : vector<16x236xbf16>, vector<236x256xbf16>, vector<16x256xf32> -> vector<16x256xf32>
    %c0_3 = arith.constant 0 : index
    %c0_4 = arith.constant 0 : index
    %3 = vector.load %arg3[%c0_3, %c0_4] : memref<1x256xf32, #tpu.memory_space<vmem>>, vector<1x256xf32>
    %4 = vector.broadcast %3 : vector<1x256xf32> to vector<16x256xf32>
    %5 = arith.addf %2, %4 : vector<16x256xf32>
    %cst_5 = arith.constant 0.000000e+00 : f32
    %6 = vector.broadcast %cst_5 : f32 to vector<16x256xf32>
    %7 = arith.maximumf %5, %6 : vector<16x256xf32>
    %8 = arith.truncf %7 : vector<16x256xf32> to vector<16x256xbf16>
    %c0_6 = arith.constant 0 : index
    %c0_7 = arith.constant 0 : index
    %9 = vector.load %arg4[%c0_6, %c0_7] : memref<256x128xbf16, #tpu.memory_space<vmem>>, vector<256x128xbf16>
    %cst_8 = arith.constant dense<0.000000e+00> : vector<16x128xf32>
    %10 = tpu.matmul %8, %9, %cst_8 {dimension_numbers = #tpu.dot_dimension_numbers<[1], [0], [0], [1], [0, 0, 1, 1], [], []>} : vector<16x256xbf16>, vector<256x128xbf16>, vector<16x128xf32> -> vector<16x128xf32>
    %c0_9 = arith.constant 0 : index
    %c0_10 = arith.constant 0 : index
    %11 = vector.load %arg5[%c0_9, %c0_10] : memref<1x128xf32, #tpu.memory_space<vmem>>, vector<1x128xf32>
    %12 = vector.broadcast %11 : vector<1x128xf32> to vector<16x128xf32>
    %13 = arith.addf %10, %12 : vector<16x128xf32>
    %cst_11 = arith.constant 0.000000e+00 : f32
    %14 = vector.broadcast %cst_11 : f32 to vector<16x128xf32>
    %15 = arith.maximumf %13, %14 : vector<16x128xf32>
    %16 = arith.truncf %15 : vector<16x128xf32> to vector<16x128xbf16>
    %c0_12 = arith.constant 0 : index
    %c0_13 = arith.constant 0 : index
    %17 = vector.load %arg6[%c0_12, %c0_13] : memref<128x64xbf16, #tpu.memory_space<vmem>>, vector<128x64xbf16>
    %cst_14 = arith.constant dense<0.000000e+00> : vector<16x64xf32>
    %18 = tpu.matmul %16, %17, %cst_14 {dimension_numbers = #tpu.dot_dimension_numbers<[1], [0], [0], [1], [0, 0, 1, 1], [], []>} : vector<16x128xbf16>, vector<128x64xbf16>, vector<16x64xf32> -> vector<16x64xf32>
    %c0_15 = arith.constant 0 : index
    %c0_16 = arith.constant 0 : index
    %19 = vector.load %arg7[%c0_15, %c0_16] : memref<1x64xf32, #tpu.memory_space<vmem>>, vector<1x64xf32>
    %20 = vector.broadcast %19 : vector<1x64xf32> to vector<16x64xf32>
    %21 = arith.addf %18, %20 : vector<16x64xf32>
    %cst_17 = arith.constant 0.000000e+00 : f32
    %22 = vector.broadcast %cst_17 : f32 to vector<16x64xf32>
    %23 = arith.maximumf %21, %22 : vector<16x64xf32>
    %24 = arith.truncf %23 : vector<16x64xf32> to vector<16x64xbf16>
    %c0_18 = arith.constant 0 : index
    %c0_19 = arith.constant 0 : index
    %25 = vector.load %arg8[%c0_18, %c0_19] : memref<64x64xbf16, #tpu.memory_space<vmem>>, vector<64x64xbf16>
    %cst_20 = arith.constant dense<0.000000e+00> : vector<16x64xf32>
    %26 = tpu.matmul %24, %25, %cst_20 {dimension_numbers = #tpu.dot_dimension_numbers<[1], [0], [0], [1], [0, 0, 1, 1], [], []>} : vector<16x64xbf16>, vector<64x64xbf16>, vector<16x64xf32> -> vector<16x64xf32>
    %c0_21 = arith.constant 0 : index
    %c0_22 = arith.constant 0 : index
    %27 = vector.load %arg9[%c0_21, %c0_22] : memref<1x64xf32, #tpu.memory_space<vmem>>, vector<1x64xf32>
    %28 = vector.broadcast %27 : vector<1x64xf32> to vector<16x64xf32>
    %29 = arith.addf %26, %28 : vector<16x64xf32>
    %cst_23 = arith.constant 0.000000e+00 : f32
    %30 = vector.broadcast %cst_23 : f32 to vector<16x64xf32>
    %31 = arith.maximumf %29, %30 : vector<16x64xf32>
    %32 = arith.truncf %31 : vector<16x64xf32> to vector<16x64xbf16>
    %c0_24 = arith.constant 0 : index
    %c0_25 = arith.constant 0 : index
    %33 = vector.load %arg10[%c0_24, %c0_25] : memref<64x64xbf16, #tpu.memory_space<vmem>>, vector<64x64xbf16>
    %cst_26 = arith.constant dense<0.000000e+00> : vector<16x64xf32>
    %34 = tpu.matmul %32, %33, %cst_26 {dimension_numbers = #tpu.dot_dimension_numbers<[1], [0], [0], [1], [0, 0, 1, 1], [], []>} : vector<16x64xbf16>, vector<64x64xbf16>, vector<16x64xf32> -> vector<16x64xf32>
    %c0_27 = arith.constant 0 : index
    %c0_28 = arith.constant 0 : index
    %35 = vector.load %arg11[%c0_27, %c0_28] : memref<1x64xf32, #tpu.memory_space<vmem>>, vector<1x64xf32>
    %36 = vector.broadcast %35 : vector<1x64xf32> to vector<16x64xf32>
    %37 = arith.addf %34, %36 : vector<16x64xf32>
    %cst_29 = arith.constant 0.000000e+00 : f32
    %38 = vector.broadcast %cst_29 : f32 to vector<16x64xf32>
    %39 = arith.maximumf %37, %38 : vector<16x64xf32>
    %40 = arith.truncf %39 : vector<16x64xf32> to vector<16x64xbf16>
    %c0_30 = arith.constant 0 : index
    %c0_31 = arith.constant 0 : index
    %41 = vector.load %arg12[%c0_30, %c0_31] : memref<64x64xbf16, #tpu.memory_space<vmem>>, vector<64x64xbf16>
    %cst_32 = arith.constant dense<0.000000e+00> : vector<16x64xf32>
    %42 = tpu.matmul %40, %41, %cst_32 {dimension_numbers = #tpu.dot_dimension_numbers<[1], [0], [0], [1], [0, 0, 1, 1], [], []>} : vector<16x64xbf16>, vector<64x64xbf16>, vector<16x64xf32> -> vector<16x64xf32>
    %c0_33 = arith.constant 0 : index
    %c0_34 = arith.constant 0 : index
    %43 = vector.load %arg13[%c0_33, %c0_34] : memref<1x64xf32, #tpu.memory_space<vmem>>, vector<1x64xf32>
    %44 = vector.broadcast %43 : vector<1x64xf32> to vector<16x64xf32>
    %45 = arith.addf %42, %44 : vector<16x64xf32>
    %cst_35 = arith.constant 0.000000e+00 : f32
    %46 = vector.broadcast %cst_35 : f32 to vector<16x64xf32>
    %47 = arith.maximumf %45, %46 : vector<16x64xf32>
    %48 = arith.truncf %47 : vector<16x64xf32> to vector<16x64xbf16>
    %c0_36 = arith.constant 0 : index
    %c0_37 = arith.constant 0 : index
    %49 = vector.load %arg14[%c0_36, %c0_37] : memref<64x64xbf16, #tpu.memory_space<vmem>>, vector<64x64xbf16>
    %cst_38 = arith.constant dense<0.000000e+00> : vector<16x64xf32>
    %50 = tpu.matmul %48, %49, %cst_38 {dimension_numbers = #tpu.dot_dimension_numbers<[1], [0], [0], [1], [0, 0, 1, 1], [], []>} : vector<16x64xbf16>, vector<64x64xbf16>, vector<16x64xf32> -> vector<16x64xf32>
    %c0_39 = arith.constant 0 : index
    %c0_40 = arith.constant 0 : index
    %51 = vector.load %arg15[%c0_39, %c0_40] : memref<1x64xf32, #tpu.memory_space<vmem>>, vector<1x64xf32>
    %52 = vector.broadcast %51 : vector<1x64xf32> to vector<16x64xf32>
    %53 = arith.addf %50, %52 : vector<16x64xf32>
    %cst_41 = arith.constant 0.000000e+00 : f32
    %54 = vector.broadcast %cst_41 : f32 to vector<16x64xf32>
    %55 = arith.maximumf %53, %54 : vector<16x64xf32>
    %56 = arith.truncf %55 : vector<16x64xf32> to vector<16x64xbf16>
    %c0_42 = arith.constant 0 : index
    %c0_43 = arith.constant 0 : index
    %57 = vector.load %arg16[%c0_42, %c0_43] : memref<64x64xbf16, #tpu.memory_space<vmem>>, vector<64x64xbf16>
    %cst_44 = arith.constant dense<0.000000e+00> : vector<16x64xf32>
    %58 = tpu.matmul %56, %57, %cst_44 {dimension_numbers = #tpu.dot_dimension_numbers<[1], [0], [0], [1], [0, 0, 1, 1], [], []>} : vector<16x64xbf16>, vector<64x64xbf16>, vector<16x64xf32> -> vector<16x64xf32>
    %c0_45 = arith.constant 0 : index
    %c0_46 = arith.constant 0 : index
    %59 = vector.load %arg17[%c0_45, %c0_46] : memref<1x64xf32, #tpu.memory_space<vmem>>, vector<1x64xf32>
    %60 = vector.broadcast %59 : vector<1x64xf32> to vector<16x64xf32>
    %61 = arith.addf %58, %60 : vector<16x64xf32>
    %cst_47 = arith.constant 0.000000e+00 : f32
    %62 = vector.broadcast %cst_47 : f32 to vector<16x64xf32>
    %63 = arith.maximumf %61, %62 : vector<16x64xf32>
    %64 = arith.truncf %63 : vector<16x64xf32> to vector<16x64xbf16>
    %c0_48 = arith.constant 0 : index
    %c0_49 = arith.constant 0 : index
    %65 = vector.load %arg18[%c0_48, %c0_49] : memref<64x128xbf16, #tpu.memory_space<vmem>>, vector<64x128xbf16>
    %cst_50 = arith.constant dense<0.000000e+00> : vector<16x128xf32>
    %66 = tpu.matmul %64, %65, %cst_50 {dimension_numbers = #tpu.dot_dimension_numbers<[1], [0], [0], [1], [0, 0, 1, 1], [], []>} : vector<16x64xbf16>, vector<64x128xbf16>, vector<16x128xf32> -> vector<16x128xf32>
    %c0_51 = arith.constant 0 : index
    %c0_52 = arith.constant 0 : index
    %67 = vector.load %arg19[%c0_51, %c0_52] : memref<1x128xf32, #tpu.memory_space<vmem>>, vector<1x128xf32>
    %68 = vector.broadcast %67 : vector<1x128xf32> to vector<16x128xf32>
    %69 = arith.addf %66, %68 : vector<16x128xf32>
    %70 = arith.truncf %69 : vector<16x128xf32> to vector<16x128xbf16>
    %c0_53 = arith.constant 0 : index
    %c0_54 = arith.constant 0 : index
    %71 = vector.load %arg20[%c0_53, %c0_54] : memref<16x128xbf16, #tpu.memory_space<vmem>>, vector<16x128xbf16>
    tpu.vector_store %arg20[%c0_53, %c0_54], %70 {strides = array<i32>} : memref<16x128xbf16, #tpu.memory_space<vmem>>, vector<16x128xbf16>,
    return
  }
  func.func @transform_0(%arg0: i32) -> (i32, i32) {
    %c0_i32 = arith.constant 0 : i32
    %c0_i32_0 = arith.constant 0 : i32
    return %arg0, %c0_i32 : i32, i32
  }
  func.func @transform_1(%arg0: i32) -> (i32, i32) {
    %c0_i32 = arith.constant 0 : i32
    %c0_i32_0 = arith.constant 0 : i32
    %c0_i32_1 = arith.constant 0 : i32
    return %c0_i32, %c0_i32_0 : i32, i32
  }
  func.func @transform_2(%arg0: i32) -> (i32, i32) {
    %c0_i32 = arith.constant 0 : i32
    %c0_i32_0 = arith.constant 0 : i32
    %c0_i32_1 = arith.constant 0 : i32
    return %c0_i32, %c0_i32_0 : i32, i32
  }
  func.func @transform_3(%arg0: i32) -> (i32, i32) {
    %c0_i32 = arith.constant 0 : i32
    %c0_i32_0 = arith.constant 0 : i32
    %c0_i32_1 = arith.constant 0 : i32
    return %c0_i32, %c0_i32_0 : i32, i32
  }
  func.func @transform_4(%arg0: i32) -> (i32, i32) {
    %c0_i32 = arith.constant 0 : i32
    %c0_i32_0 = arith.constant 0 : i32
    %c0_i32_1 = arith.constant 0 : i32
    return %c0_i32, %c0_i32_0 : i32, i32
  }
  func.func @transform_5(%arg0: i32) -> (i32, i32) {
    %c0_i32 = arith.constant 0 : i32
    %c0_i32_0 = arith.constant 0 : i32
    %c0_i32_1 = arith.constant 0 : i32
    return %c0_i32, %c0_i32_0 : i32, i32
  }
  func.func @transform_6(%arg0: i32) -> (i32, i32) {
    %c0_i32 = arith.constant 0 : i32
    %c0_i32_0 = arith.constant 0 : i32
    %c0_i32_1 = arith.constant 0 : i32
    return %c0_i32, %c0_i32_0 : i32, i32
  }
  func.func @transform_7(%arg0: i32) -> (i32, i32) {
    %c0_i32 = arith.constant 0 : i32
    %c0_i32_0 = arith.constant 0 : i32
    %c0_i32_1 = arith.constant 0 : i32
    return %c0_i32, %c0_i32_0 : i32, i32
  }
  func.func @transform_8(%arg0: i32) -> (i32, i32) {
    %c0_i32 = arith.constant 0 : i32
    %c0_i32_0 = arith.constant 0 : i32
    %c0_i32_1 = arith.constant 0 : i32
    return %c0_i32, %c0_i32_0 : i32, i32
  }
  func.func @transform_9(%arg0: i32) -> (i32, i32) {
    %c0_i32 = arith.constant 0 : i32
    %c0_i32_0 = arith.constant 0 : i32
    %c0_i32_1 = arith.constant 0 : i32
    return %c0_i32, %c0_i32_0 : i32, i32
  }
  func.func @transform_10(%arg0: i32) -> (i32, i32) {
    %c0_i32 = arith.constant 0 : i32
    %c0_i32_0 = arith.constant 0 : i32
    %c0_i32_1 = arith.constant 0 : i32
    return %c0_i32, %c0_i32_0 : i32, i32
  }
  func.func @transform_11(%arg0: i32) -> (i32, i32) {
    %c0_i32 = arith.constant 0 : i32
    %c0_i32_0 = arith.constant 0 : i32
    %c0_i32_1 = arith.constant 0 : i32
    return %c0_i32, %c0_i32_0 : i32, i32
  }
  func.func @transform_12(%arg0: i32) -> (i32, i32) {
    %c0_i32 = arith.constant 0 : i32
    %c0_i32_0 = arith.constant 0 : i32
    %c0_i32_1 = arith.constant 0 : i32
    return %c0_i32, %c0_i32_0 : i32, i32
  }
  func.func @transform_13(%arg0: i32) -> (i32, i32) {
    %c0_i32 = arith.constant 0 : i32
    %c0_i32_0 = arith.constant 0 : i32
    %c0_i32_1 = arith.constant 0 : i32
    return %c0_i32, %c0_i32_0 : i32, i32
  }
  func.func @transform_14(%arg0: i32) -> (i32, i32) {
    %c0_i32 = arith.constant 0 : i32
    %c0_i32_0 = arith.constant 0 : i32
    %c0_i32_1 = arith.constant 0 : i32
    return %c0_i32, %c0_i32_0 : i32, i32
  }
  func.func @transform_15(%arg0: i32) -> (i32, i32) {
    %c0_i32 = arith.constant 0 : i32
    %c0_i32_0 = arith.constant 0 : i32
    %c0_i32_1 = arith.constant 0 : i32
    return %c0_i32, %c0_i32_0 : i32, i32
  }
  func.func @transform_16(%arg0: i32) -> (i32, i32) {
    %c0_i32 = arith.constant 0 : i32
    %c0_i32_0 = arith.constant 0 : i32
    %c0_i32_1 = arith.constant 0 : i32
    return %c0_i32, %c0_i32_0 : i32, i32
  }
  func.func @transform_17(%arg0: i32) -> (i32, i32) {
    %c0_i32 = arith.constant 0 : i32
    %c0_i32_0 = arith.constant 0 : i32
    %c0_i32_1 = arith.constant 0 : i32
    return %c0_i32, %c0_i32_0 : i32, i32
  }
  func.func @transform_18(%arg0: i32) -> (i32, i32) {
    %c0_i32 = arith.constant 0 : i32
    %c0_i32_0 = arith.constant 0 : i32
    %c0_i32_1 = arith.constant 0 : i32
    return %c0_i32, %c0_i32_0 : i32, i32
  }
  func.func @transform_19(%arg0: i32) -> (i32, i32) {
    %c0_i32 = arith.constant 0 : i32
    %c0_i32_0 = arith.constant 0 : i32
    return %arg0, %c0_i32 : i32, i32
  }
}

</mosaic_0001>

<bundles_post_ra>
// kernel: tpu_custom_call.1
= control target key start
LH: loop header
LB: loop body
LE: loop exit
PB: predicated region body
PF: predicated region fallthrough
CT: control target
= control target key end

     0   :  { %s1925_s0 = inlined_call_operand.hbm [shape: bf16[16,236], index: 0, kind: input, shape index: {}]   ;;  %s1926_s1 = inlined_call_operand.hbm [shape: bf16[236,256], index: 1, kind: input, shape index: {}]   ;;  %s1927_s2 = inlined_call_operand.hbm [shape: f32[1,256], index: 2, kind: input, shape index: {}]   ;;  %s1928_s3 = inlined_call_operand.hbm [shape: bf16[256,128], index: 3, kind: input, shape index: {}]   ;;  %s1929_s4 = inlined_call_operand.vmem [shape: f32[1,128], index: 4, kind: input, shape index: {}]   ;;  %s1930_s5 = inlined_call_operand.vmem [shape: bf16[128,64], index: 5, kind: input, shape index: {}]   ;;  %s1931_s6 = inlined_call_operand.vmem [shape: f32[1,64], index: 6, kind: input, shape index: {}]   ;;  %s1932_s7 = inlined_call_operand.vmem [shape: bf16[64,64], index: 7, kind: input, shape index: {}]   ;;  %s1933_s8 = inlined_call_operand.vmem [shape: f32[1,64], index: 8, kind: input, shape index: {}]   ;;  %s1934_s9 = inlined_call_operand.vmem [shape: bf16[64,64], index: 9, kind: input, shape index: {}]   ;;  %s1935_s10 = inlined_call_operand.vmem [shape: f32[1,64], index: 10, kind: input, shape index: {}]   ;;  %s1936_s11 = inlined_call_operand.vmem [shape: bf16[64,64], index: 11, kind: input, shape index: {}]   ;;  %s1937_s12 = inlined_call_operand.vmem [shape: f32[1,64], index: 12, kind: input, shape index: {}]   ;;  %s1938_s13 = inlined_call_operand.hbm [shape: bf16[64,64], index: 13, kind: input, shape index: {}]   ;;  %s1939_s14 = inlined_call_operand.vmem [shape: f32[1,64], index: 14, kind: input, shape index: {}]   ;;  %s1940_s15 = inlined_call_operand.hbm [shape: bf16[64,64], index: 15, kind: input, shape index: {}]   ;;  %s1941_s16 = inlined_call_operand.vmem [shape: f32[1,64], index: 16, kind: input, shape index: {}]   ;;  %s1942_s17 = inlined_call_operand.hbm [shape: bf16[64,128], index: 17, kind: input, shape index: {}]   ;;  %s1943_s18 = inlined_call_operand.vmem [shape: f32[1,128], index: 18, kind: input, shape index: {}]   ;;  %s1944_s19 = inlined_call_operand.hbm [shape: bf16[16,128], index: 19, kind: output, shape index: {}]  }
   0x1   :  { %1947 = sst [smem:[#allocation20_spill]] %s1925_s0 }
   0x2   :  { %1948 = sst [smem:[#allocation21_spill]] %s1926_s1 }
   0x3   :  { %1949 = sst [smem:[#allocation22_spill]] %s1927_s2 }
   0x4   :  { %1950 = sst [smem:[#allocation23_spill]] %s1928_s3 }
   0x5   :  { %1951 = sst [smem:[#allocation24_spill]] %s1941_s16 }
   0x6   :  { %1952 = sst [smem:[#allocation25_spill]] %s1943_s18 }
   0x7   :  { %1953 = sst [smem:[#allocation26_spill]] %s1944_s19 }
   0x8   :  { %24 = vsyncpa [#allocation3], 0 }
   0x9   :  { %25 = vsyncpa [#allocation6], 0 }
   0xa   :  { %26 = vsyncpa [#allocation9], 0 }
   0xb   :  { %27 = vsyncpa [#allocation12], 0 }
   0xc   :  { %28 = vsyncpa [#allocation4], 0  ;;  %s1954_s20 = sld [smem:[#allocation21_spill]]  ;;  %s1682_s1 = smov [#allocation5]  }
   0xd   :  { %s48_s22 = sshll.u32 %s1682_s1, 4  ;;  %s1955_s24 = sld [smem:[#allocation23_spill]]  ;;  %s49_s22 = int_to_ptr.vmem [resolvable:$true] %s48_s22 }
   0xe   :  { %s1683_s3 = smov 128   ;;  %s1684_s26 = smov 8  }
   0xf   :  { %s1685_s27 = smov [#allocation8]   ;;  %s1945_s29 = smov 64  }
  0x10   :  { %s72_s28 = sshll.u32 %s1685_s27, 4  ;;  %s1687_s19 = smov 4   ;;  %s73_s28 = int_to_ptr.vmem [resolvable:$true] %s72_s28 }
  0x11   :  { %s1688_s1 = smov [#allocation11]   ;;  %s1689_s27 = smov [#allocation2]  }
  0x12   :  { %s46_s21 = sshll.u32 %s1954_s20, 4  ;;  %s116_s20 = sshll.u32 %s1940_s15, 4  ;;  %s47_s21 = int_to_ptr.hbm [resolvable:$true] %s46_s21  ;;  %s117_s20 = int_to_ptr.hbm [resolvable:$true] %s116_s20 }
  0x13   :  { %s70_s25 = sshll.u32 %s1955_s24, 4  ;;  %s118_s2 = sshll.u32 %s1688_s1, 4  ;;  %s71_s25 = int_to_ptr.hbm [resolvable:$true] %s70_s25  ;;  %s119_s2 = int_to_ptr.vmem [resolvable:$true] %s118_s2 }
  0x14   :  { %54 = dma.hbm_to_vmem [thread:$0]  %s47_s21, 3840, %s49_s22, [#allocation6], %s1683_s3, %s1683_s3, %s1684_s26  }
  0x15   :  { %78 = dma.hbm_to_vmem [thread:$0]  %s71_s25, 2048, %s73_s28, [#allocation9], %s1945_s29, %s1945_s29, %s1687_s19  }
  0x16   :  { %s1956_s22 = sld [smem:[#allocation20_spill]]  ;;  %s35_s18 = sshll.u32 %s1689_s27, 4  ;;  %s36_s18 = int_to_ptr.vmem [resolvable:$true] %s35_s18 }
  0x17   :  { %124 = dma.hbm_to_vmem [thread:$0]  %s117_s20, 512, %s119_s2, [#allocation12], %s1945_s29, %s1945_s29, %s1687_s19  }
  0x18   :  { %s1957_s16 = sld [smem:[#allocation22_spill]]  ;;  %s101_s1 = sshll.u32 %s1938_s13, 4  ;;  %s102_s1 = int_to_ptr.hbm [resolvable:$true] %s101_s1 }
  0x19   :  { %s1690_s23 = smov [#allocation7]   ;;  %s1691_s20 = smov [#allocation10]  }
  0x1a   :  { %s62_s21 = sshll.u32 %s1690_s23, 4  ;;  %s103_s2 = sshll.u32 %s1691_s20, 4  ;;  %s63_s21 = int_to_ptr.vmem [resolvable:$true] %s62_s21  ;;  %s104_s2 = int_to_ptr.vmem [resolvable:$true] %s103_s2 }
  0x1b   :  { %s131_s29 = sshll.u32 %s1942_s17, 4  ;;  %s132_s29 = int_to_ptr.hbm [resolvable:$true] %s131_s29 }
  0x1c   :  { %s33_s24 = sshll.u32 %s1956_s22, 4  ;;  %s34_s24 = int_to_ptr.hbm [resolvable:$true] %s33_s24 }
  0x1d   :  { %41 = dma.hbm_to_vmem [thread:$0]  %s34_s24, 256, %s36_s18, [#allocation3], %s1683_s3, %s1683_s3, %s1684_s26  }
  0x1e   :  { %s60_s0 = sshll.u32 %s1957_s16, 4  ;;  %s1958_s16 = smov 64   ;;  %s61_s0 = int_to_ptr.hbm [resolvable:$true] %s60_s0 }
  0x1f   :  { %65 = dma.hbm_to_vmem [thread:$0]  %s61_s0, 32, %s63_s21, [#allocation6]  }
  0x20   :  { %109 = dma.hbm_to_vmem [thread:$0]  %s102_s1, 512, %s104_s2, [#allocation9], %s1958_s16, %s1958_s16, %s1687_s19  }
  0x21   :  { %s1692_s18 = smov [#allocation13]  }
  0x22   :  { %s133_s3 = sshll.u32 %s1692_s18, 4  ;;  %s134_s3 = int_to_ptr.vmem [resolvable:$true] %s133_s3 }
  0x23   :  { %139 = dma.hbm_to_vmem [thread:$0]  %s132_s29, 512, %s134_s3, [#allocation12], %s1958_s16, %s1958_s16, %s1687_s19  }
  0x24   :  { %1672 = dma.done.wait [#allocation3], 256  }
  0x25   :  { %1673 = vsyncadd [#allocation3], 4294967040 }
  0x26   :  { %1674 = dma.done.wait [#allocation6], 3872  }
  0x27   :  { %1675 = vsyncadd [#allocation6], 4294963424 }
  0x28   :  { %1676 = dma.done.wait [#allocation9], 2560  }
  0x29   :  { %1677 = vsyncadd [#allocation9], 4294964736 }
  0x2a   :  { %1678 = dma.done.wait [#allocation12], 1024  }
  0x2b   :  { %1679 = vsyncadd [#allocation12], 4294966272  ;;  %vm370_vm0 = vcmask 1045504   ;;  %v1113_v0 = vld [vmem:[#allocation5 + $0x70] sm:$0xf]  ;;  %vm366_vm1 = vcmask 883712  }
  0x2c   :  { %v1392_v1 = vld [vmem:[#allocation5 + $0x74] sm:$0xf0]  ;;  %v1391_v2 = vld [vmem:[#allocation5 + $0x74] sm:$0xf]  ;;  %v1115_v4 = vld [vmem:[#allocation5 + $0x78] sm:$0xf0] }
  0x2d   :  { %v1114_v3 = vor.u32 %v1392_v1, %v1113_v0  ;;  %v1405_v5 = vld [vmem:[#allocation5 + $0xe4] sm:$0xf]  ;;  %v1171_v6 = vld [vmem:[#allocation5 + $0xe8] sm:$0x30]  ;;  %v1118_v7 = vor.u32 %v1391_v2, %v1115_v4  ;;  %v1105_v9 = vld [vmem:[#allocation5 + $0x60] sm:$0xf] }
  0x2e   :  { %v1174_v8 = vor.u32 %v1405_v5, %v1171_v6  ;;  %v1390_v10 = vld [vmem:[#allocation5 + $0x64] sm:$0xf0]  ;;  %v1389_v11 = vld [vmem:[#allocation5 + $0x64] sm:$0xf]  ;;  %v1107_v13 = vld [vmem:[#allocation5 + $0x68] sm:$0xf0] }
  0x2f   :  { %377 = vmatpush.bf16.msra.mxu0 %v1114_v3  ;;  %v1106_v12 = vor.u32 %v1390_v10, %v1105_v9  ;;  %v1403_v14 = vld [vmem:[#allocation5 + $0xd4] sm:$0xf]  ;;  %v1163_v15 = vld [vmem:[#allocation5 + $0xd8] sm:$0xf0]  ;;  %405 = vmatpush.bf16.msra.mxu2 %v1118_v7  ;;  %v1110_v17 = vor.u32 %v1389_v11, %v1107_v13  ;;  %v1169_v18 = vld [vmem:[#allocation5 + $0xe0] sm:$0xf] }
  0x30   :  { %v375_v16 = vsel %vm370_vm0, %v1174_v8, 0  ;;  %v1406_v19 = vld [vmem:[#allocation5 + $0xe4] sm:$0x30]  ;;  %v1166_v20 = vor.u32 %v1403_v14, %v1163_v15  ;;  %v1097_v22 = vld [vmem:[#allocation5 + $0x50] sm:$0xf]  ;;  %vm723_vm2 = vcmask 523264  }
  0x31   :  { %420 = vmatpush.bf16.msra.mxu3 %v375_v16  ;;  %v1170_v21 = vor.u32 %v1406_v19, %v1169_v18  ;;  %v1388_v23 = vld [vmem:[#allocation5 + $0x54] sm:$0xf0]  ;;  %v1387_v24 = vld [vmem:[#allocation5 + $0x54] sm:$0xf]  ;;  %v1099_v25 = vld [vmem:[#allocation5 + $0x58] sm:$0xf0] }
  0x32   :  { %v1401_v26 = vld [vmem:[#allocation5 + $0xc4] sm:$0xf]  ;;  %v1155_v27 = vld [vmem:[#allocation5 + $0xc8] sm:$0xf0]  ;;  %v1098_v29 = vor.u32 %v1388_v23, %v1097_v22  ;;  %v1161_v30 = vld [vmem:[#allocation5 + $0xd0] sm:$0xf]  ;;  %v1102_v32 = vor.u32 %v1387_v24, %v1099_v25 }
  0x33   :  { %378 = vmatpush.bf16.msra.mxu0 %v1106_v12  ;;  %v372_v28 = vsel %vm370_vm0, %v1170_v21, 0  ;;  %v1404_v31 = vld [vmem:[#allocation5 + $0xd4] sm:$0xf0]  ;;  %406 = vmatpush.bf16.msra.mxu2 %v1110_v17  ;;  %v1089_v34 = vld [vmem:[#allocation5 + $0x40] sm:$0xf]  ;;  %v1158_v36 = vor.u32 %v1401_v26, %v1155_v27  ;;  %v1422_v27 = vld [vmem:[#allocation8 + $0x78] sm:$0xff] }
  0x34   :  { %392 = vmatpush.bf16.msra.mxu1 %v372_v28  ;;  %v1162_v33 = vor.u32 %v1404_v31, %v1161_v30  ;;  %v1386_v35 = vld [vmem:[#allocation5 + $0x44] sm:$0xf0]  ;;  %v1385_v37 = vld [vmem:[#allocation5 + $0x44] sm:$0xf]  ;;  %v1091_v38 = vld [vmem:[#allocation5 + $0x48] sm:$0xf0] }
  0x35   :  { %421 = vmatpush.bf16.msra.mxu3 %v1166_v20  ;;  %v1399_v39 = vld [vmem:[#allocation5 + $0xb4] sm:$0xf]  ;;  %v1147_v40 = vld [vmem:[#allocation5 + $0xb8] sm:$0xf0]  ;;  %v1153_v41 = vld [vmem:[#allocation5 + $0xc0] sm:$0xf]  ;;  %v1090_v43 = vor.u32 %v1386_v35, %v1089_v34  ;;  %v1094_v44 = vor.u32 %v1385_v37, %v1091_v38 }
  0x36   :  { %v1402_v42 = vld [vmem:[#allocation5 + $0xc4] sm:$0xf0]  ;;  %v1081_v46 = vld [vmem:[#allocation5 + $0x30] sm:$0xf]  ;;  %v1384_v47 = vld [vmem:[#allocation5 + $0x34] sm:$0xf0]  ;;  %v1150_v49 = vor.u32 %v1399_v39, %v1147_v40 }
  0x37   :  { %379 = vmatpush.bf16.msra.mxu0 %v1098_v29  ;;  %407 = vmatpush.bf16.msra.mxu2 %v1102_v32  ;;  %v1154_v45 = vor.u32 %v1402_v42, %v1153_v41  ;;  %v1383_v48 = vld [vmem:[#allocation5 + $0x34] sm:$0xf]  ;;  %v1083_v50 = vld [vmem:[#allocation5 + $0x38] sm:$0xf0]  ;;  %v1145_v51 = vld [vmem:[#allocation5 + $0xb0] sm:$0xf]  ;;  %v1082_v55 = vor.u32 %v1384_v47, %v1081_v46 }
  0x38   :  { %393 = vmatpush.bf16.msra.mxu1 %v1162_v33  ;;  %v1400_v52 = vld [vmem:[#allocation5 + $0xb4] sm:$0xf0]  ;;  %v1397_v53 = vld [vmem:[#allocation5 + $0xa4] sm:$0xf]  ;;  %v1139_v54 = vld [vmem:[#allocation5 + $0xa8] sm:$0xf0]  ;;  %v1086_v56 = vor.u32 %v1383_v48, %v1083_v50 }
  0x39   :  { %422 = vmatpush.bf16.msra.mxu3 %v1158_v36  ;;  %v1146_v57 = vor.u32 %v1400_v52, %v1145_v51  ;;  %v1073_v58 = vld [vmem:[#allocation5 + $0x20] sm:$0xf]  ;;  %v1382_v59 = vld [vmem:[#allocation5 + $0x24] sm:$0xf0]  ;;  %v1381_v60 = vld [vmem:[#allocation5 + $0x24] sm:$0xf]  ;;  %v1142_v61 = vor.u32 %v1397_v53, %v1139_v54 }
  0x3a   :  { %v1075_v62 = vld [vmem:[#allocation5 + $0x28] sm:$0xf0]  ;;  %v1137_v63 = vld [vmem:[#allocation5 + $0xa0] sm:$0xf]  ;;  %v1398_v0 = vld [vmem:[#allocation5 + $0xa4] sm:$0xf0]  ;;  %v1074_v3 = vor.u32 %v1382_v59, %v1073_v58 }
  0x3b   :  { %380 = vmatpush.bf16.msra.mxu0 %v1090_v43  ;;  %408 = vmatpush.bf16.msra.mxu2 %v1094_v44  ;;  %v1395_v1 = vld [vmem:[#allocation5 + $0x94] sm:$0xf]  ;;  %v1131_v2 = vld [vmem:[#allocation5 + $0x98] sm:$0xf0]  ;;  %v1065_v4 = vld [vmem:[#allocation5 + $0x10] sm:$0xf]  ;;  %v1078_v5 = vor.u32 %v1381_v60, %v1075_v62  ;;  %v1138_v6 = vor.u32 %v1398_v0, %v1137_v63 }
  0x3c   :  { %394 = vmatpush.bf16.msra.mxu1 %v1154_v45  ;;  %v1380_v7 = vld [vmem:[#allocation5 + $0x14] sm:$0xf0]  ;;  %v1379_v8 = vld [vmem:[#allocation5 + $0x14] sm:$0xf]  ;;  %v1067_v9 = vld [vmem:[#allocation5 + $0x18] sm:$0xf0]  ;;  %v1134_v10 = vor.u32 %v1395_v1, %v1131_v2 }
  0x3d   :  { %423 = vmatpush.bf16.msra.mxu3 %v1150_v49  ;;  %v1393_v11 = vld [vmem:[#allocation5 + $0x84] sm:$0xf]  ;;  %v1129_v12 = vld [vmem:[#allocation5 + $0x90] sm:$0xf]  ;;  %v1396_v13 = vld [vmem:[#allocation5 + $0x94] sm:$0xf0]  ;;  %v1066_v17 = vor.u32 %v1380_v7, %v1065_v4  ;;  %v1070_v22 = vor.u32 %v1379_v8, %v1067_v9 }
  0x3e   :  { %v1123_v14 = vld [vmem:[#allocation5 + $0x88] sm:$0xf0]  ;;  %v1057_v15 = vld [vmem:[#allocation5] sm:$0xf]  ;;  %v1378_v16 = vld [vmem:[#allocation5 + $0x4] sm:$0xf0]  ;;  %v1130_v23 = vor.u32 %v1396_v13, %v1129_v12 }
  0x3f   :  { %381 = vmatpush.bf16.msra.mxu0 %v1082_v55  ;;  %409 = vmatpush.bf16.msra.mxu2 %v1086_v56  ;;  %v1377_v18 = vld [vmem:[#allocation5 + $0x4] sm:$0xf]  ;;  %v1059_v19 = vld [vmem:[#allocation5 + $0x8] sm:$0xf0]  ;;  %v1375_v20 = vld [vmem:[#allocation2 + $0x4] sm:$0xf]  ;;  %v1126_v26 = vor.u32 %v1393_v11, %v1123_v14  ;;  %v1058_v28 = vor.u32 %v1378_v16, %v1057_v15 }
  0x40   :  { %395 = vmatpush.bf16.msra.mxu1 %v1146_v57  ;;  %v1051_v21 = vld [vmem:[#allocation2 + $0x8] sm:$0xf0]  ;;  %v1121_v24 = vld [vmem:[#allocation5 + $0x80] sm:$0xf]  ;;  %v1394_v25 = vld [vmem:[#allocation5 + $0x84] sm:$0xf0]  ;;  %v1062_v31 = vor.u32 %v1377_v18, %v1059_v19 }
  0x41   :  { %424 = vmatpush.bf16.msra.mxu3 %v1142_v61  ;;  %v1049_v29 = vld [vmem:[#allocation2] sm:$0xf]  ;;  %v1376_v30 = vld [vmem:[#allocation2 + $0x4] sm:$0xf0]  ;;  %v1054_v32 = vor.u32 %v1375_v20, %v1051_v21  ;;  %v1122_v33 = vor.u32 %v1394_v25, %v1121_v24  ;;  %v1421_v36 = vld [vmem:[#allocation8 + $0x70] sm:$0xff]  ;;  %s1959_s25 = sld [smem:[#allocation24_spill]] }
  0x42   :  { %v1050_v34 = vor.u32 %v1376_v30, %v1049_v29  ;;  %v1414_v35 = vld [vmem:[#allocation8 + $0x38] sm:$0xff]  ;;  %v1413_v37 = vld [vmem:[#allocation8 + $0x30] sm:$0xff]  ;;  %v1412_v38 = vld [vmem:[#allocation8 + $0x28] sm:$0xff]  ;;  %s1960_s0 = sld [smem:[#allocation25_spill]]  ;;  %s1693_s15 = smov [#allocation14]  }
  0x43   :  { %382 = vmatpush.bf16.msra.mxu0 %v1074_v3  ;;  %410 = vmatpush.bf16.msra.mxu2 %v1078_v5  ;;  %v1411_v39 = vld [vmem:[#allocation8 + $0x20] sm:$0xff]  ;;  %v1420_v40 = vld [vmem:[#allocation8 + $0x68] sm:$0xff]  ;;  %v1410_v41 = vld [vmem:[#allocation8 + $0x18] sm:$0xff]  ;;  %s1961_s23 = sld [smem:[#allocation26_spill]] }
  0x44   :  { %396 = vmatpush.bf16.msra.mxu1 %v1138_v6  ;;  %v1419_v42 = vld [vmem:[#allocation8 + $0x60] sm:$0xff]  ;;  %v1409_v43 = vld [vmem:[#allocation8 + $0x10] sm:$0xff]  ;;  %v1418_v44 = vld [vmem:[#allocation8 + $0x58] sm:$0xff] }
  0x45   :  { %425 = vmatpush.bf16.msra.mxu3 %v1134_v10  ;;  %v1408_v45 = vld [vmem:[#allocation8 + $0x8] sm:$0xff]  ;;  %v1417_v46 = vld [vmem:[#allocation8 + $0x50] sm:$0xff]  ;;  %v1407_v47 = vld [vmem:[#allocation8] sm:$0xff] }
  0x46   :  { %v1416_v48 = vld [vmem:[#allocation8 + $0x48] sm:$0xff]  ;;  %v1415_v49 = vld [vmem:[#allocation8 + $0x40] sm:$0xff]  ;;  %v1430_v50 = vld [vmem:[%s1930_s5 + $0x38] sm:$0xff] }
  0x47   :  { %383 = vmatpush.bf16.msra.mxu0 %v1066_v17  ;;  %411 = vmatpush.bf16.msra.mxu2 %v1070_v22  ;;  %v203_v51 = vld [vmem:[#allocation7] sm:$0x3]  ;;  %v1429_v12 = vld [vmem:[%s1930_s5 + $0x30] sm:$0xff]  ;;  %v1428_v13 = vld [vmem:[%s1930_s5 + $0x28] sm:$0xff] }
  0x48   :  { %397 = vmatpush.bf16.msra.mxu1 %v1130_v23  ;;  %v205_v52 = vperm.slane %v203_v51, 0  ;;  %v206_v59 = vperm.slane %v203_v51, 1  ;;  %v1427_v14 = vld [vmem:[%s1930_s5 + $0x20] sm:$0xff]  ;;  %v1426_v15 = vld [vmem:[%s1930_s5 + $0x18] sm:$0xff]  ;;  %v1425_v16 = vld [vmem:[%s1930_s5 + $0x10] sm:$0xff] }
  0x49   :  { %426 = vmatpush.bf16.msra.mxu3 %v1126_v26  ;;  %v1424_v17 = vld [vmem:[%s1930_s5 + $0x8] sm:$0xff]  ;;  %v1423_v18 = vld [vmem:[%s1930_s5] sm:$0xff]  ;;  %v1434_v19 = vld [vmem:[%s1932_s7 + $0x18] sm:$0xff] }
  0x4a   :  { %v1472_v22 = vld [vmem:[%s1929_s4] ss:$0 sm:$0xff] }
  0x4b   :  { %384 = vmatpush.bf16.msra.mxu0 %v1058_v28  ;;  %412 = vmatpush.bf16.msra.mxu2 %v1062_v31 }
  0x4c   :  { %1176 = vmatmul.msk.bf16.vlgmr.msra.gmra.mxu3 %vm366_vm1, %v1054_v32  ;;  %398 = vmatpush.bf16.msra.mxu1 %v1122_v33  ;;  %v1432_v33 = vld [vmem:[%s1932_s7 + $0x8] sm:$0xff] }
  0x4d   :  { %585 = vmatpush.bf16.msrb.mxu3 %v1422_v27 }
  0x4e   :  { %385 = vmatmul.bf16.vlgmr.msra.gmra.mxu0 %v1050_v34  ;;  %413 = vmatmul.bf16.vlgmr.msra.gmra.mxu2 %v1050_v34  ;;  %v1431_v34 = vld [vmem:[%s1932_s7] sm:$0xff] }
  0x4f   :  { %1175 = vmatmul.msk.bf16.vlgmr.msra.gmra.mxu1 %vm366_vm1, %v1054_v32  ;;  %670 = vmatpush.bf16.msrb.mxu0 %v1430_v50  ;;  %v1433_v32 = vld [vmem:[%s1932_s7 + $0x10] sm:$0xff]  ;;  %s1029_s7 = sshll.u32 %s1693_s15, 4  ;;  %s1030_s7 = int_to_ptr.vmem [resolvable:$true] %s1029_s7 }
  0x50   :  { %571 = vmatpush.bf16.msrb.mxu1 %v1414_v35  ;;  %731 = vmatpush.bf16.msrb.mxu2 %v1434_v19  ;;  %v1438_v35 = vld [vmem:[%s1934_s9 + $0x18] sm:$0xff] }
  0x51   :  { %586 = vmatpush.bf16.msrb.mxu3 %v1421_v36  ;;  %v1454_v19 = vld [vmem:[#allocation13 + $0x18] sm:$0xff] }
  0x53   :  { %671 = vmatpush.bf16.msrb.mxu0 %v1429_v12 }
  0x54   :  { %572 = vmatpush.bf16.msrb.mxu1 %v1413_v37  ;;  %732 = vmatpush.bf16.msrb.mxu2 %v1433_v32  ;;  %v1473_v37 = vld [vmem:[%s1931_s6] ss:$0 sm:$0xff]  ;;  %s1031_s6 = sshll.u32 %s1961_s23, 4  ;;  %s1032_s6 = int_to_ptr.hbm [resolvable:$true] %s1031_s6 }
  0x55   :  { %587 = vmatpush.bf16.msrb.mxu3 %v1420_v40  ;;  %v1478_v32 = vld [vmem:[%s1959_s25] ss:$0 sm:$0xff] }
  0x57   :  { %672 = vmatpush.bf16.msrb.mxu0 %v1428_v13 }
  0x58   :  { %573 = vmatpush.bf16.msrb.mxu1 %v1412_v38  ;;  %733 = vmatpush.bf16.msrb.mxu2 %v1432_v33 }
  0x59   :  { %588 = vmatpush.bf16.msrb.mxu3 %v1419_v42 }
  0x5b   :  { %673 = vmatpush.bf16.msrb.mxu0 %v1427_v14 }
  0x5c   :  { %574 = vmatpush.bf16.msrb.mxu1 %v1411_v39  ;;  %734 = vmatpush.bf16.msrb.mxu2 %v1431_v34 }
  0x5d   :  { %589 = vmatpush.bf16.msrb.mxu3 %v1418_v44  ;;  %v1437_v44 = vld [vmem:[%s1934_s9 + $0x10] sm:$0xff] }
  0x5f   :  { %674 = vmatpush.bf16.msrb.mxu0 %v1426_v15 }
  0x60   :  { %575 = vmatpush.bf16.msrb.mxu1 %v1410_v41  ;;  %787 = vmatpush.bf16.msra.mxu2 %v1438_v35 }
  0x61   :  { %590 = vmatpush.bf16.msrb.mxu3 %v1417_v46  ;;  %v1435_v46 = vld [vmem:[%s1934_s9] sm:$0xff] }
  0x63   :  { %675 = vmatpush.bf16.msrb.mxu0 %v1425_v16  ;;  %v1449_v16 = vld [vmem:[#allocation11 + $0x10] sm:$0xff] }
  0x64   :  { %576 = vmatpush.bf16.msrb.mxu1 %v1409_v43  ;;  %788 = vmatpush.bf16.msra.mxu2 %v1437_v44 }
  0x65   :  { %591 = vmatpush.bf16.msrb.mxu3 %v1416_v48 }
  0x67   :  { %676 = vmatpush.bf16.msrb.mxu0 %v1424_v17  ;;  %v1448_v17 = vld [vmem:[#allocation11 + $0x8] sm:$0xff] }
  0x68   :  { %577 = vmatpush.bf16.msrb.mxu1 %v1408_v45  ;;  %v1436_v45 = vld [vmem:[%s1934_s9 + $0x8] sm:$0xff] }
  0x69   :  { %592 = vmatpush.bf16.msrb.mxu3 %v1415_v49  ;;  %789 = vmatpush.bf16.msra.mxu2 %v1436_v45  ;;  %v1474_v49 = vld [vmem:[%s1933_s8] ss:$0 sm:$0xff] }
  0x6b   :  { %677 = vmatpush.bf16.msrb.mxu0 %v1423_v18  ;;  %v1447_v18 = vld [vmem:[#allocation11] sm:$0xff] }
  0x6c   :  { %578 = vmatpush.bf16.msrb.mxu1 %v1407_v47  ;;  %v1442_v47 = vld [vmem:[%s1936_s11 + $0x18] sm:$0xff] }
  0x6d   :  { %790 = vmatpush.bf16.msra.mxu2 %v1435_v46 }
  0x70   :  { %843 = vmatpush.bf16.msra.mxu1 %v1442_v47 }
  0xcb   :  { %v386_v53 = vpop.f32.mrf.mxu0 }
  0xcc   :  { %v400_v54 = vpop.f32.mrf.mxu1  ;;  %v387_v55 = vadd.f32 %v386_v53, %v205_v52 }
  0xce   :  { %v401_v56 = vadd.f32 %v400_v54, %v387_v55 }
  0xcf   :  { %v428_v57 = vpop.f32.mrf.mxu3 }
  0xd0   :  { %v433_v63 = vmax.f32 %v401_v56, 0.0  ;;  %v1441_v56 = vld [vmem:[%s1936_s11 + $0x10] sm:$0xff] }
  0xd1   :  { %v414_v58 = vpop.f32.mrf.mxu2  ;;  %844 = vmatpush.bf16.msra.mxu1 %v1441_v56 }
  0xd2   :  { %v415_v1 = vadd.f32 %v414_v58, %v206_v59  ;;  %v1439_v58 = vld [vmem:[%s1936_s11] sm:$0xff] }
  0xd3   :  { %v388_v60 = vpop.f32.mrf.mxu0 }
  0xd4   :  { %v389_v61 = vadd.f32 %v388_v60, %v205_v52  ;;  %v402_v62 = vpop.f32.mrf.mxu1  ;;  %v429_v5 = vadd.f32 %v428_v57, %v415_v1  ;;  %v1440_v57 = vld [vmem:[%s1936_s11 + $0x8] sm:$0xff] }
  0xd5   :  { %845 = vmatpush.bf16.msra.mxu1 %v1440_v57 }
  0xd6   :  { %v403_v0 = vadd.f32 %v402_v62, %v389_v61  ;;  %v434_v9 = vmax.f32 %v429_v5, 0.0  ;;  %v1475_v61 = vld [vmem:[%s1935_s10] ss:$0 sm:$0xff]  ;;  %v1444_v5 = vld [vmem:[#allocation10 + $0x8] sm:$0xff] }
  0xd7   :  { %v430_v7 = vpop.f32.mrf.mxu3 }
  0xd8   :  { %v435_v2 = vmax.f32 %v403_v0, 0.0 }
  0xd9   :  { %v416_v4 = vpop.f32.mrf.mxu2  ;;  %846 = vmatpush.bf16.msra.mxu1 %v1439_v58 }
  0xda   :  { %v437_v3 = vpack.c.bf16 %v435_v2, %v433_v63  ;;  %v417_v6 = vadd.f32 %v416_v4, %v206_v59  ;;  %v1446_v59 = vld [vmem:[#allocation10 + $0x18] sm:$0xff]  ;;  %v1445_v4 = vld [vmem:[#allocation10 + $0x10] sm:$0xff] }
  0xdb   :  { %899 = vmatpush.bf16.msra.mxu3 %v1446_v59 }
  0xdc   :  { %579 = vmatmul.bf16.vlgmr.msrb.gmra.mxu1 %v437_v3  ;;  %v431_v8 = vadd.f32 %v430_v7, %v417_v6  ;;  %v1443_v6 = vld [vmem:[#allocation10] sm:$0xff]  ;;  %v1450_v7 = vld [vmem:[#allocation11 + $0x18] sm:$0xff] }
  0xdd   :  { %955 = vmatpush.bf16.msra.mxu0 %v1450_v7 }
  0xde   :  { %v436_v10 = vmax.f32 %v431_v8, 0.0 }
  0xdf   :  { %900 = vmatpush.bf16.msra.mxu3 %v1445_v4 }
  0xe0   :  { %v438_v11 = vpack.c.bf16 %v436_v10, %v434_v9  ;;  %v1476_v9 = vld [vmem:[%s1937_s12] ss:$0 sm:$0xff] }
  0xe1   :  { %956 = vmatpush.bf16.msra.mxu0 %v1449_v16 }
  0xe2   :  { %593 = vmatmul.bf16.vlgmr.msrb.gmra.mxu3 %v438_v11 }
  0xe3   :  { %901 = vmatpush.bf16.msra.mxu3 %v1444_v5 }
  0xe5   :  { %957 = vmatpush.bf16.msra.mxu0 %v1448_v17 }
  0xe7   :  { %902 = vmatpush.bf16.msra.mxu3 %v1443_v6 }
  0xe9   :  { %958 = vmatpush.bf16.msra.mxu0 %v1447_v18 }
 0x159   :  { %v580_v20 = vpop.f32.mrf.mxu1 }
 0x15a   :  { %v581_v24 = vadd.f32 %v1472_v22, %v580_v20 }
 0x161   :  { %v582_v23 = vpop.f32.mrf.mxu1 }
 0x162   :  { %v583_v25 = vadd.f32 %v1472_v22, %v582_v23 }
 0x165   :  { %v594_v21 = vpop.f32.mrf.mxu3 }
 0x166   :  { %v595_v26 = vadd.f32 %v594_v21, %v581_v24  ;;  %v1477_v21 = vld [vmem:[%s1939_s14] ss:$0 sm:$0xff] }
 0x168   :  { %v599_v29 = vmax.f32 %v595_v26, 0.0 }
 0x16d   :  { %v596_v27 = vpop.f32.mrf.mxu3 }
 0x16e   :  { %v597_v28 = vadd.f32 %v596_v27, %v583_v25 }
 0x170   :  { %v600_v30 = vmax.f32 %v597_v28, 0.0  ;;  %v1453_v28 = vld [vmem:[#allocation13 + $0x10] sm:$0xff] }
 0x172   :  { %v601_v31 = vpack.c.bf16 %v600_v30, %v599_v29  ;;  %v1452_v29 = vld [vmem:[#allocation13 + $0x8] sm:$0xff]  ;;  %v1451_v30 = vld [vmem:[#allocation13] sm:$0xff] }
 0x174   :  { %678 = vmatmul.bf16.vlgmr.msrb.gmra.mxu0 %v601_v31 }
 0x1f1   :  { %v679_v36 = vpop.f32.mrf.mxu0 }
 0x1f2   :  { %v680_v38 = vadd.f32 %v1473_v37, %v679_v36 }
 0x1f4   :  { %v684_v41 = vmax.f32 %v680_v38, 0.0 }
 0x1f9   :  { %v681_v39 = vpop.f32.mrf.mxu0 }
 0x1fa   :  { %v682_v40 = vadd.f32 %v1473_v37, %v681_v39 }
 0x1fc   :  { %v685_v42 = vmax.f32 %v682_v40, 0.0  ;;  %v1479_v40 = vld [vmem:[%s1960_s0] ss:$0 sm:$0xff] }
 0x1fe   :  { %v686_v43 = vpack.c.bf16 %v685_v42, %v684_v41 }
 0x200   :  { %1289 = vmatmul.msk.bf16.vlgmr.msrb.gmra.mxu2 %vm723_vm2, %v686_v43 }
 0x201   :  { %1011 = vmatpush.bf16.msrb.mxu2 %v1454_v19 }
 0x205   :  { %1012 = vmatpush.bf16.msrb.mxu2 %v1453_v28 }
 0x209   :  { %1013 = vmatpush.bf16.msrb.mxu2 %v1452_v29 }
 0x20d   :  { %1014 = vmatpush.bf16.msrb.mxu2 %v1451_v30 }
 0x283   :  { %v736_v48 = vpop.f32.mrf.mxu2 }
 0x284   :  { %v737_v50 = vadd.f32 %v1474_v49, %v736_v48 }
 0x286   :  { %v741_v53 = vmax.f32 %v737_v50, 0.0 }
 0x28b   :  { %v738_v51 = vpop.f32.mrf.mxu2 }
 0x28c   :  { %v739_v52 = vadd.f32 %v1474_v49, %v738_v51 }
 0x28e   :  { %v742_v54 = vmax.f32 %v739_v52, 0.0 }
 0x290   :  { %v743_v55 = vpack.c.bf16 %v742_v54, %v741_v53 }
 0x292   :  { %1306 = vmatmul.msk.bf16.vlgmr.msra.gmra.mxu2 %vm723_vm2, %v743_v55 }
 0x315   :  { %v792_v60 = vpop.f32.mrf.mxu2 }
 0x316   :  { %v793_v62 = vadd.f32 %v1475_v61, %v792_v60 }
 0x318   :  { %v797_v1 = vmax.f32 %v793_v62, 0.0 }
 0x31d   :  { %v794_v63 = vpop.f32.mrf.mxu2 }
 0x31e   :  { %v795_v0 = vadd.f32 %v1475_v61, %v794_v63 }
 0x320   :  { %v798_v2 = vmax.f32 %v795_v0, 0.0 }
 0x322   :  { %v799_v3 = vpack.c.bf16 %v798_v2, %v797_v1 }
 0x324   :  { %1323 = vmatmul.msk.bf16.vlgmr.msra.gmra.mxu1 %vm723_vm2, %v799_v3 }
 0x3a1   :  { %v848_v8 = vpop.f32.mrf.mxu1 }
 0x3a2   :  { %v849_v10 = vadd.f32 %v1476_v9, %v848_v8 }
 0x3a4   :  { %v853_v13 = vmax.f32 %v849_v10, 0.0 }
 0x3a9   :  { %v850_v11 = vpop.f32.mrf.mxu1 }
 0x3aa   :  { %v851_v12 = vadd.f32 %v1476_v9, %v850_v11 }
 0x3ac   :  { %v854_v14 = vmax.f32 %v851_v12, 0.0 }
 0x3ae   :  { %v855_v15 = vpack.c.bf16 %v854_v14, %v853_v13 }
 0x3b0   :  { %1340 = vmatmul.msk.bf16.vlgmr.msra.gmra.mxu3 %vm723_vm2, %v855_v15 }
 0x433   :  { %v904_v20 = vpop.f32.mrf.mxu3 }
 0x434   :  { %v905_v22 = vadd.f32 %v1477_v21, %v904_v20 }
 0x436   :  { %v909_v25 = vmax.f32 %v905_v22, 0.0 }
 0x43b   :  { %v906_v23 = vpop.f32.mrf.mxu3 }
 0x43c   :  { %v907_v24 = vadd.f32 %v1477_v21, %v906_v23 }
 0x43e   :  { %v910_v26 = vmax.f32 %v907_v24, 0.0 }
 0x440   :  { %v911_v27 = vpack.c.bf16 %v910_v26, %v909_v25 }
 0x442   :  { %1357 = vmatmul.msk.bf16.vlgmr.msra.gmra.mxu0 %vm723_vm2, %v911_v27 }
 0x4bf   :  { %v960_v31 = vpop.f32.mrf.mxu0 }
 0x4c0   :  { %v961_v33 = vadd.f32 %v1478_v32, %v960_v31 }
 0x4c2   :  { %v965_v36 = vmax.f32 %v961_v33, 0.0 }
 0x4c7   :  { %v962_v34 = vpop.f32.mrf.mxu0 }
 0x4c8   :  { %v963_v35 = vadd.f32 %v1478_v32, %v962_v34 }
 0x4ca   :  { %v966_v37 = vmax.f32 %v963_v35, 0.0 }
 0x4cc   :  { %v967_v38 = vpack.c.bf16 %v966_v37, %v965_v36 }
 0x4ce   :  { %1374 = vmatmul.msk.bf16.vlgmr.msrb.gmra.mxu2 %vm723_vm2, %v967_v38 }
 0x551   :  { %v1016_v39 = vpop.f32.mrf.mxu2 }
 0x552   :  { %v1017_v42 = vadd.f32 %v1479_v40, %v1016_v39 }
 0x559   :  { %v1018_v41 = vpop.f32.mrf.mxu2 }
 0x55a   :  { %v1019_v43 = vadd.f32 %v1479_v40, %v1018_v41 }
 0x55c   :  { %v1458_v44 = vpack.c.bf16 %v1019_v43, %v1017_v42 }
 0x55e   :  { %1459 = vst [vmem:[#allocation14] sm:$0xff] %v1458_v44  }
 0x55f   :  { %1037 = dma.vmem_to_hbm [thread:$0]  %s1030_s7, 128, %s1032_s6, [#allocation4], %s1958_s16, %s1958_s16, %s1687_s19  }
 0x560   :  { %1680 = dma.done.wait [#allocation4], 128  }
 0x561   :  { %1681 = vsyncadd [#allocation4], 4294967168 }
 0x562   :  { %1042 = vsyncpa [#allocation3], 1 }
 0x563   :  { %1043 = vsyncpa [#allocation6], 1 }
 0x564   :  { %1044 = vsyncpa [#allocation9], 1 }
 0x565   :  { %1045 = vsyncpa [#allocation12], 1 }
 0x566   :  { %1046 = vsyncpa [#allocation4], 1 }

// kernel: tpu_custom_call.1
= control target key start
LH: loop header
LB: loop body
LE: loop exit
PB: predicated region body
PF: predicated region fallthrough
CT: control target
= control target key end

     0   :  { %s1925_s0 = inlined_call_operand.hbm [shape: bf16[16,236], index: 0, kind: input, shape index: {}]   ;;  %s1926_s1 = inlined_call_operand.hbm [shape: bf16[236,256], index: 1, kind: input, shape index: {}]   ;;  %s1927_s2 = inlined_call_operand.hbm [shape: f32[1,256], index: 2, kind: input, shape index: {}]   ;;  %s1928_s3 = inlined_call_operand.hbm [shape: bf16[256,128], index: 3, kind: input, shape index: {}]   ;;  %s1929_s4 = inlined_call_operand.vmem [shape: f32[1,128], index: 4, kind: input, shape index: {}]   ;;  %s1930_s5 = inlined_call_operand.vmem [shape: bf16[128,64], index: 5, kind: input, shape index: {}]   ;;  %s1931_s6 = inlined_call_operand.vmem [shape: f32[1,64], index: 6, kind: input, shape index: {}]   ;;  %s1932_s7 = inlined_call_operand.vmem [shape: bf16[64,64], index: 7, kind: input, shape index: {}]   ;;  %s1933_s8 = inlined_call_operand.vmem [shape: f32[1,64], index: 8, kind: input, shape index: {}]   ;;  %s1934_s9 = inlined_call_operand.vmem [shape: bf16[64,64], index: 9, kind: input, shape index: {}]   ;;  %s1935_s10 = inlined_call_operand.vmem [shape: f32[1,64], index: 10, kind: input, shape index: {}]   ;;  %s1936_s11 = inlined_call_operand.vmem [shape: bf16[64,64], index: 11, kind: input, shape index: {}]   ;;  %s1937_s12 = inlined_call_operand.vmem [shape: f32[1,64], index: 12, kind: input, shape index: {}]   ;;  %s1938_s13 = inlined_call_operand.hbm [shape: bf16[64,64], index: 13, kind: input, shape index: {}]   ;;  %s1939_s14 = inlined_call_operand.vmem [shape: f32[1,64], index: 14, kind: input, shape index: {}]   ;;  %s1940_s15 = inlined_call_operand.hbm [shape: bf16[64,64], index: 15, kind: input, shape index: {}]   ;;  %s1941_s16 = inlined_call_operand.vmem [shape: f32[1,64], index: 16, kind: input, shape index: {}]   ;;  %s1942_s17 = inlined_call_operand.hbm [shape: bf16[64,128], index: 17, kind: input, shape index: {}]   ;;  %s1943_s18 = inlined_call_operand.vmem [shape: f32[1,128], index: 18, kind: input, shape index: {}]   ;;  %s1944_s19 = inlined_call_operand.hbm [shape: bf16[16,128], index: 19, kind: output, shape index: {}]  }
   0x1   :  { %1947 = sst [smem:[#allocation20_spill]] %s1925_s0 }
   0x2   :  { %1948 = sst [smem:[#allocation21_spill]] %s1926_s1 }
   0x3   :  { %1949 = sst [smem:[#allocation22_spill]] %s1927_s2 }
   0x4   :  { %1950 = sst [smem:[#allocation23_spill]] %s1928_s3 }
   0x5   :  { %1951 = sst [smem:[#allocation24_spill]] %s1941_s16 }
   0x6   :  { %1952 = sst [smem:[#allocation25_spill]] %s1943_s18 }
   0x7   :  { %1953 = sst [smem:[#allocation26_spill]] %s1944_s19 }
   0x8   :  { %24 = vsyncpa [#allocation3], 0 }
   0x9   :  { %25 = vsyncpa [#allocation6], 0 }
   0xa   :  { %26 = vsyncpa [#allocation9], 0 }
   0xb   :  { %27 = vsyncpa [#allocation12], 0 }
   0xc   :  { %28 = vsyncpa [#allocation4], 0  ;;  %s1954_s20 = sld [smem:[#allocation21_spill]]  ;;  %s1682_s1 = smov [#allocation5]  }
   0xd   :  { %s48_s22 = sshll.u32 %s1682_s1, 4  ;;  %s1955_s24 = sld [smem:[#allocation23_spill]]  ;;  %s49_s22 = int_to_ptr.vmem [resolvable:$true] %s48_s22 }
   0xe   :  { %s1683_s3 = smov 128   ;;  %s1684_s26 = smov 8  }
   0xf   :  { %s1685_s27 = smov [#allocation8]   ;;  %s1945_s29 = smov 64  }
  0x10   :  { %s72_s28 = sshll.u32 %s1685_s27, 4  ;;  %s1687_s19 = smov 4   ;;  %s73_s28 = int_to_ptr.vmem [resolvable:$true] %s72_s28 }
  0x11   :  { %s1688_s1 = smov [#allocation11]   ;;  %s1689_s27 = smov [#allocation2]  }
  0x12   :  { %s46_s21 = sshll.u32 %s1954_s20, 4  ;;  %s116_s20 = sshll.u32 %s1940_s15, 4  ;;  %s47_s21 = int_to_ptr.hbm [resolvable:$true] %s46_s21  ;;  %s117_s20 = int_to_ptr.hbm [resolvable:$true] %s116_s20 }
  0x13   :  { %s70_s25 = sshll.u32 %s1955_s24, 4  ;;  %s118_s2 = sshll.u32 %s1688_s1, 4  ;;  %s71_s25 = int_to_ptr.hbm [resolvable:$true] %s70_s25  ;;  %s119_s2 = int_to_ptr.vmem [resolvable:$true] %s118_s2 }
  0x14   :  { %54 = dma.hbm_to_vmem [thread:$0]  %s47_s21, 3840, %s49_s22, [#allocation6], %s1683_s3, %s1683_s3, %s1684_s26  }
  0x15   :  { %78 = dma.hbm_to_vmem [thread:$0]  %s71_s25, 2048, %s73_s28, [#allocation9], %s1945_s29, %s1945_s29, %s1687_s19  }
  0x16   :  { %s1956_s22 = sld [smem:[#allocation20_spill]]  ;;  %s35_s18 = sshll.u32 %s1689_s27, 4  ;;  %s36_s18 = int_to_ptr.vmem [resolvable:$true] %s35_s18 }
  0x17   :  { %124 = dma.hbm_to_vmem [thread:$0]  %s117_s20, 512, %s119_s2, [#allocation12], %s1945_s29, %s1945_s29, %s1687_s19  }
  0x18   :  { %s1957_s16 = sld [smem:[#allocation22_spill]]  ;;  %s101_s1 = sshll.u32 %s1938_s13, 4  ;;  %s102_s1 = int_to_ptr.hbm [resolvable:$true] %s101_s1 }
  0x19   :  { %s1690_s23 = smov [#allocation7]   ;;  %s1691_s20 = smov [#allocation10]  }
  0x1a   :  { %s62_s21 = sshll.u32 %s1690_s23, 4  ;;  %s103_s2 = sshll.u32 %s1691_s20, 4  ;;  %s63_s21 = int_to_ptr.vmem [resolvable:$true] %s62_s21  ;;  %s104_s2 = int_to_ptr.vmem [resolvable:$true] %s103_s2 }
  0x1b   :  { %s131_s29 = sshll.u32 %s1942_s17, 4  ;;  %s132_s29 = int_to_ptr.hbm [resolvable:$true] %s131_s29 }
  0x1c   :  { %s33_s24 = sshll.u32 %s1956_s22, 4  ;;  %s34_s24 = int_to_ptr.hbm [resolvable:$true] %s33_s24 }
  0x1d   :  { %41 = dma.hbm_to_vmem [thread:$0]  %s34_s24, 256, %s36_s18, [#allocation3], %s1683_s3, %s1683_s3, %s1684_s26  }
  0x1e   :  { %s60_s0 = sshll.u32 %s1957_s16, 4  ;;  %s1958_s16 = smov 64   ;;  %s61_s0 = int_to_ptr.hbm [resolvable:$true] %s60_s0 }
  0x1f   :  { %65 = dma.hbm_to_vmem [thread:$0]  %s61_s0, 32, %s63_s21, [#allocation6]  }
  0x20   :  { %109 = dma.hbm_to_vmem [thread:$0]  %s102_s1, 512, %s104_s2, [#allocation9], %s1958_s16, %s1958_s16, %s1687_s19  }
  0x21   :  { %s1692_s18 = smov [#allocation13]  }
  0x22   :  { %s133_s3 = sshll.u32 %s1692_s18, 4  ;;  %s134_s3 = int_to_ptr.vmem [resolvable:$true] %s133_s3 }
  0x23   :  { %139 = dma.hbm_to_vmem [thread:$0]  %s132_s29, 512, %s134_s3, [#allocation12], %s1958_s16, %s1958_s16, %s1687_s19  }
  0x24   :  { %1672 = dma.done.wait [#allocation3], 256  }
  0x25   :  { %1673 = vsyncadd [#allocation3], 4294967040 }
  0x26   :  { %1674 = dma.done.wait [#allocation6], 3872  }
  0x27   :  { %1675 = vsyncadd [#allocation6], 4294963424 }
  0x28   :  { %1676 = dma.done.wait [#allocation9], 2560  }
  0x29   :  { %1677 = vsyncadd [#allocation9], 4294964736 }
  0x2a   :  { %1678 = dma.done.wait [#allocation12], 1024  }
  0x2b   :  { %1679 = vsyncadd [#allocation12], 4294966272  ;;  %vm370_vm0 = vcmask 1045504   ;;  %v1113_v0 = vld [vmem:[#allocation5 + $0x70] sm:$0xf]  ;;  %vm366_vm1 = vcmask 883712  }
  0x2c   :  { %v1392_v1 = vld [vmem:[#allocation5 + $0x74] sm:$0xf0]  ;;  %v1391_v2 = vld [vmem:[#allocation5 + $0x74] sm:$0xf]  ;;  %v1115_v4 = vld [vmem:[#allocation5 + $0x78] sm:$0xf0] }
  0x2d   :  { %v1114_v3 = vor.u32 %v1392_v1, %v1113_v0  ;;  %v1405_v5 = vld [vmem:[#allocation5 + $0xe4] sm:$0xf]  ;;  %v1171_v6 = vld [vmem:[#allocation5 + $0xe8] sm:$0x30]  ;;  %v1118_v7 = vor.u32 %v1391_v2, %v1115_v4  ;;  %v1105_v9 = vld [vmem:[#allocation5 + $0x60] sm:$0xf] }
  0x2e   :  { %v1174_v8 = vor.u32 %v1405_v5, %v1171_v6  ;;  %v1390_v10 = vld [vmem:[#allocation5 + $0x64] sm:$0xf0]  ;;  %v1389_v11 = vld [vmem:[#allocation5 + $0x64] sm:$0xf]  ;;  %v1107_v13 = vld [vmem:[#allocation5 + $0x68] sm:$0xf0] }
  0x2f   :  { %377 = vmatpush.bf16.msra.mxu0 %v1114_v3  ;;  %v1106_v12 = vor.u32 %v1390_v10, %v1105_v9  ;;  %v1403_v14 = vld [vmem:[#allocation5 + $0xd4] sm:$0xf]  ;;  %v1163_v15 = vld [vmem:[#allocation5 + $0xd8] sm:$0xf0]  ;;  %405 = vmatpush.bf16.msra.mxu2 %v1118_v7  ;;  %v1110_v17 = vor.u32 %v1389_v11, %v1107_v13  ;;  %v1169_v18 = vld [vmem:[#allocation5 + $0xe0] sm:$0xf] }
  0x30   :  { %v375_v16 = vsel %vm370_vm0, %v1174_v8, 0  ;;  %v1406_v19 = vld [vmem:[#allocation5 + $0xe4] sm:$0x30]  ;;  %v1166_v20 = vor.u32 %v1403_v14, %v1163_v15  ;;  %v1097_v22 = vld [vmem:[#allocation5 + $0x50] sm:$0xf]  ;;  %vm723_vm2 = vcmask 523264  }
  0x31   :  { %420 = vmatpush.bf16.msra.mxu3 %v375_v16  ;;  %v1170_v21 = vor.u32 %v1406_v19, %v1169_v18  ;;  %v1388_v23 = vld [vmem:[#allocation5 + $0x54] sm:$0xf0]  ;;  %v1387_v24 = vld [vmem:[#allocation5 + $0x54] sm:$0xf]  ;;  %v1099_v25 = vld [vmem:[#allocation5 + $0x58] sm:$0xf0] }
  0x32   :  { %v1401_v26 = vld [vmem:[#allocation5 + $0xc4] sm:$0xf]  ;;  %v1155_v27 = vld [vmem:[#allocation5 + $0xc8] sm:$0xf0]  ;;  %v1098_v29 = vor.u32 %v1388_v23, %v1097_v22  ;;  %v1161_v30 = vld [vmem:[#allocation5 + $0xd0] sm:$0xf]  ;;  %v1102_v32 = vor.u32 %v1387_v24, %v1099_v25 }
  0x33   :  { %378 = vmatpush.bf16.msra.mxu0 %v1106_v12  ;;  %v372_v28 = vsel %vm370_vm0, %v1170_v21, 0  ;;  %v1404_v31 = vld [vmem:[#allocation5 + $0xd4] sm:$0xf0]  ;;  %406 = vmatpush.bf16.msra.mxu2 %v1110_v17  ;;  %v1089_v34 = vld [vmem:[#allocation5 + $0x40] sm:$0xf]  ;;  %v1158_v36 = vor.u32 %v1401_v26, %v1155_v27  ;;  %v1422_v27 = vld [vmem:[#allocation8 + $0x78] sm:$0xff] }
  0x34   :  { %392 = vmatpush.bf16.msra.mxu1 %v372_v28  ;;  %v1162_v33 = vor.u32 %v1404_v31, %v1161_v30  ;;  %v1386_v35 = vld [vmem:[#allocation5 + $0x44] sm:$0xf0]  ;;  %v1385_v37 = vld [vmem:[#allocation5 + $0x44] sm:$0xf]  ;;  %v1091_v38 = vld [vmem:[#allocation5 + $0x48] sm:$0xf0] }
  0x35   :  { %421 = vmatpush.bf16.msra.mxu3 %v1166_v20  ;;  %v1399_v39 = vld [vmem:[#allocation5 + $0xb4] sm:$0xf]  ;;  %v1147_v40 = vld [vmem:[#allocation5 + $0xb8] sm:$0xf0]  ;;  %v1153_v41 = vld [vmem:[#allocation5 + $0xc0] sm:$0xf]  ;;  %v1090_v43 = vor.u32 %v1386_v35, %v1089_v34  ;;  %v1094_v44 = vor.u32 %v1385_v37, %v1091_v38 }
  0x36   :  { %v1402_v42 = vld [vmem:[#allocation5 + $0xc4] sm:$0xf0]  ;;  %v1081_v46 = vld [vmem:[#allocation5 + $0x30] sm:$0xf]  ;;  %v1384_v47 = vld [vmem:[#allocation5 + $0x34] sm:$0xf0]  ;;  %v1150_v49 = vor.u32 %v1399_v39, %v1147_v40 }
  0x37   :  { %379 = vmatpush.bf16.msra.mxu0 %v1098_v29  ;;  %407 = vmatpush.bf16.msra.mxu2 %v1102_v32  ;;  %v1154_v45 = vor.u32 %v1402_v42, %v1153_v41  ;;  %v1383_v48 = vld [vmem:[#allocation5 + $0x34] sm:$0xf]  ;;  %v1083_v50 = vld [vmem:[#allocation5 + $0x38] sm:$0xf0]  ;;  %v1145_v51 = vld [vmem:[#allocation5 + $0xb0] sm:$0xf]  ;;  %v1082_v55 = vor.u32 %v1384_v47, %v1081_v46 }
  0x38   :  { %393 = vmatpush.bf16.msra.mxu1 %v1162_v33  ;;  %v1400_v52 = vld [vmem:[#allocation5 + $0xb4] sm:$0xf0]  ;;  %v1397_v53 = vld [vmem:[#allocation5 + $0xa4] sm:$0xf]  ;;  %v1139_v54 = vld [vmem:[#allocation5 + $0xa8] sm:$0xf0]  ;;  %v1086_v56 = vor.u32 %v1383_v48, %v1083_v50 }
  0x39   :  { %422 = vmatpush.bf16.msra.mxu3 %v1158_v36  ;;  %v1146_v57 = vor.u32 %v1400_v52, %v1145_v51  ;;  %v1073_v58 = vld [vmem:[#allocation5 + $0x20] sm:$0xf]  ;;  %v1382_v59 = vld [vmem:[#allocation5 + $0x24] sm:$0xf0]  ;;  %v1381_v60 = vld [vmem:[#allocation5 + $0x24] sm:$0xf]  ;;  %v1142_v61 = vor.u32 %v1397_v53, %v1139_v54 }
  0x3a   :  { %v1075_v62 = vld [vmem:[#allocation5 + $0x28] sm:$0xf0]  ;;  %v1137_v63 = vld [vmem:[#allocation5 + $0xa0] sm:$0xf]  ;;  %v1398_v0 = vld [vmem:[#allocation5 + $0xa4] sm:$0xf0]  ;;  %v1074_v3 = vor.u32 %v1382_v59, %v1073_v58 }
  0x3b   :  { %380 = vmatpush.bf16.msra.mxu0 %v1090_v43  ;;  %408 = vmatpush.bf16.msra.mxu2 %v1094_v44  ;;  %v1395_v1 = vld [vmem:[#allocation5 + $0x94] sm:$0xf]  ;;  %v1131_v2 = vld [vmem:[#allocation5 + $0x98] sm:$0xf0]  ;;  %v1065_v4 = vld [vmem:[#allocation5 + $0x10] sm:$0xf]  ;;  %v1078_v5 = vor.u32 %v1381_v60, %v1075_v62  ;;  %v1138_v6 = vor.u32 %v1398_v0, %v1137_v63 }
  0x3c   :  { %394 = vmatpush.bf16.msra.mxu1 %v1154_v45  ;;  %v1380_v7 = vld [vmem:[#allocation5 + $0x14] sm:$0xf0]  ;;  %v1379_v8 = vld [vmem:[#allocation5 + $0x14] sm:$0xf]  ;;  %v1067_v9 = vld [vmem:[#allocation5 + $0x18] sm:$0xf0]  ;;  %v1134_v10 = vor.u32 %v1395_v1, %v1131_v2 }
  0x3d   :  { %423 = vmatpush.bf16.msra.mxu3 %v1150_v49  ;;  %v1393_v11 = vld [vmem:[#allocation5 + $0x84] sm:$0xf]  ;;  %v1129_v12 = vld [vmem:[#allocation5 + $0x90] sm:$0xf]  ;;  %v1396_v13 = vld [vmem:[#allocation5 + $0x94] sm:$0xf0]  ;;  %v1066_v17 = vor.u32 %v1380_v7, %v1065_v4  ;;  %v1070_v22 = vor.u32 %v1379_v8, %v1067_v9 }
  0x3e   :  { %v1123_v14 = vld [vmem:[#allocation5 + $0x88] sm:$0xf0]  ;;  %v1057_v15 = vld [vmem:[#allocation5] sm:$0xf]  ;;  %v1378_v16 = vld [vmem:[#allocation5 + $0x4] sm:$0xf0]  ;;  %v1130_v23 = vor.u32 %v1396_v13, %v1129_v12 }
  0x3f   :  { %381 = vmatpush.bf16.msra.mxu0 %v1082_v55  ;;  %409 = vmatpush.bf16.msra.mxu2 %v1086_v56  ;;  %v1377_v18 = vld [vmem:[#allocation5 + $0x4] sm:$0xf]  ;;  %v1059_v19 = vld [vmem:[#allocation5 + $0x8] sm:$0xf0]  ;;  %v1375_v20 = vld [vmem:[#allocation2 + $0x4] sm:$0xf]  ;;  %v1126_v26 = vor.u32 %v1393_v11, %v1123_v14  ;;  %v1058_v28 = vor.u32 %v1378_v16, %v1057_v15 }
  0x40   :  { %395 = vmatpush.bf16.msra.mxu1 %v1146_v57  ;;  %v1051_v21 = vld [vmem:[#allocation2 + $0x8] sm:$0xf0]  ;;  %v1121_v24 = vld [vmem:[#allocation5 + $0x80] sm:$0xf]  ;;  %v1394_v25 = vld [vmem:[#allocation5 + $0x84] sm:$0xf0]  ;;  %v1062_v31 = vor.u32 %v1377_v18, %v1059_v19 }
  0x41   :  { %424 = vmatpush.bf16.msra.mxu3 %v1142_v61  ;;  %v1049_v29 = vld [vmem:[#allocation2] sm:$0xf]  ;;  %v1376_v30 = vld [vmem:[#allocation2 + $0x4] sm:$0xf0]  ;;  %v1054_v32 = vor.u32 %v1375_v20, %v1051_v21  ;;  %v1122_v33 = vor.u32 %v1394_v25, %v1121_v24  ;;  %v1421_v36 = vld [vmem:[#allocation8 + $0x70] sm:$0xff]  ;;  %s1959_s25 = sld [smem:[#allocation24_spill]] }
  0x42   :  { %v1050_v34 = vor.u32 %v1376_v30, %v1049_v29  ;;  %v1414_v35 = vld [vmem:[#allocation8 + $0x38] sm:$0xff]  ;;  %v1413_v37 = vld [vmem:[#allocation8 + $0x30] sm:$0xff]  ;;  %v1412_v38 = vld [vmem:[#allocation8 + $0x28] sm:$0xff]  ;;  %s1960_s0 = sld [smem:[#allocation25_spill]]  ;;  %s1693_s15 = smov [#allocation14]  }
  0x43   :  { %382 = vmatpush.bf16.msra.mxu0 %v1074_v3  ;;  %410 = vmatpush.bf16.msra.mxu2 %v1078_v5  ;;  %v1411_v39 = vld [vmem:[#allocation8 + $0x20] sm:$0xff]  ;;  %v1420_v40 = vld [vmem:[#allocation8 + $0x68] sm:$0xff]  ;;  %v1410_v41 = vld [vmem:[#allocation8 + $0x18] sm:$0xff]  ;;  %s1961_s23 = sld [smem:[#allocation26_spill]] }
  0x44   :  { %396 = vmatpush.bf16.msra.mxu1 %v1138_v6  ;;  %v1419_v42 = vld [vmem:[#allocation8 + $0x60] sm:$0xff]  ;;  %v1409_v43 = vld [vmem:[#allocation8 + $0x10] sm:$0xff]  ;;  %v1418_v44 = vld [vmem:[#allocation8 + $0x58] sm:$0xff] }
  0x45   :  { %425 = vmatpush.bf16.msra.mxu3 %v1134_v10  ;;  %v1408_v45 = vld [vmem:[#allocation8 + $0x8] sm:$0xff]  ;;  %v1417_v46 = vld [vmem:[#allocation8 + $0x50] sm:$0xff]  ;;  %v1407_v47 = vld [vmem:[#allocation8] sm:$0xff] }
  0x46   :  { %v1416_v48 = vld [vmem:[#allocation8 + $0x48] sm:$0xff]  ;;  %v1415_v49 = vld [vmem:[#allocation8 + $0x40] sm:$0xff]  ;;  %v1430_v50 = vld [vmem:[%s1930_s5 + $0x38] sm:$0xff] }
  0x47   :  { %383 = vmatpush.bf16.msra.mxu0 %v1066_v17  ;;  %411 = vmatpush.bf16.msra.mxu2 %v1070_v22  ;;  %v203_v51 = vld [vmem:[#allocation7] sm:$0x3]  ;;  %v1429_v12 = vld [vmem:[%s1930_s5 + $0x30] sm:$0xff]  ;;  %v1428_v13 = vld [vmem:[%s1930_s5 + $0x28] sm:$0xff] }
  0x48   :  { %397 = vmatpush.bf16.msra.mxu1 %v1130_v23  ;;  %v205_v52 = vperm.slane %v203_v51, 0  ;;  %v206_v59 = vperm.slane %v203_v51, 1  ;;  %v1427_v14 = vld [vmem:[%s1930_s5 + $0x20] sm:$0xff]  ;;  %v1426_v15 = vld [vmem:[%s1930_s5 + $0x18] sm:$0xff]  ;;  %v1425_v16 = vld [vmem:[%s1930_s5 + $0x10] sm:$0xff] }
  0x49   :  { %426 = vmatpush.bf16.msra.mxu3 %v1126_v26  ;;  %v1424_v17 = vld [vmem:[%s1930_s5 + $0x8] sm:$0xff]  ;;  %v1423_v18 = vld [vmem:[%s1930_s5] sm:$0xff]  ;;  %v1434_v19 = vld [vmem:[%s1932_s7 + $0x18] sm:$0xff] }
  0x4a   :  { %v1472_v22 = vld [vmem:[%s1929_s4] ss:$0 sm:$0xff] }
  0x4b   :  { %384 = vmatpush.bf16.msra.mxu0 %v1058_v28  ;;  %412 = vmatpush.bf16.msra.mxu2 %v1062_v31 }
  0x4c   :  { %1176 = vmatmul.msk.bf16.vlgmr.msra.gmra.mxu3 %vm366_vm1, %v1054_v32  ;;  %398 = vmatpush.bf16.msra.mxu1 %v1122_v33  ;;  %v1432_v33 = vld [vmem:[%s1932_s7 + $0x8] sm:$0xff] }
  0x4d   :  { %585 = vmatpush.bf16.msrb.mxu3 %v1422_v27 }
  0x4e   :  { %385 = vmatmul.bf16.vlgmr.msra.gmra.mxu0 %v1050_v34  ;;  %413 = vmatmul.bf16.vlgmr.msra.gmra.mxu2 %v1050_v34  ;;  %v1431_v34 = vld [vmem:[%s1932_s7] sm:$0xff] }
  0x4f   :  { %1175 = vmatmul.msk.bf16.vlgmr.msra.gmra.mxu1 %vm366_vm1, %v1054_v32  ;;  %670 = vmatpush.bf16.msrb.mxu0 %v1430_v50  ;;  %v1433_v32 = vld [vmem:[%s1932_s7 + $0x10] sm:$0xff]  ;;  %s1029_s7 = sshll.u32 %s1693_s15, 4  ;;  %s1030_s7 = int_to_ptr.vmem [resolvable:$true] %s1029_s7 }
  0x50   :  { %571 = vmatpush.bf16.msrb.mxu1 %v1414_v35  ;;  %731 = vmatpush.bf16.msrb.mxu2 %v1434_v19  ;;  %v1438_v35 = vld [vmem:[%s1934_s9 + $0x18] sm:$0xff] }
  0x51   :  { %586 = vmatpush.bf16.msrb.mxu3 %v1421_v36  ;;  %v1454_v19 = vld [vmem:[#allocation13 + $0x18] sm:$0xff] }
  0x53   :  { %671 = vmatpush.bf16.msrb.mxu0 %v1429_v12 }
  0x54   :  { %572 = vmatpush.bf16.msrb.mxu1 %v1413_v37  ;;  %732 = vmatpush.bf16.msrb.mxu2 %v1433_v32  ;;  %v1473_v37 = vld [vmem:[%s1931_s6] ss:$0 sm:$0xff]  ;;  %s1031_s6 = sshll.u32 %s1961_s23, 4  ;;  %s1032_s6 = int_to_ptr.hbm [resolvable:$true] %s1031_s6 }
  0x55   :  { %587 = vmatpush.bf16.msrb.mxu3 %v1420_v40  ;;  %v1478_v32 = vld [vmem:[%s1959_s25] ss:$0 sm:$0xff] }
  0x57   :  { %672 = vmatpush.bf16.msrb.mxu0 %v1428_v13 }
  0x58   :  { %573 = vmatpush.bf16.msrb.mxu1 %v1412_v38  ;;  %733 = vmatpush.bf16.msrb.mxu2 %v1432_v33 }
  0x59   :  { %588 = vmatpush.bf16.msrb.mxu3 %v1419_v42 }
  0x5b   :  { %673 = vmatpush.bf16.msrb.mxu0 %v1427_v14 }
  0x5c   :  { %574 = vmatpush.bf16.msrb.mxu1 %v1411_v39  ;;  %734 = vmatpush.bf16.msrb.mxu2 %v1431_v34 }
  0x5d   :  { %589 = vmatpush.bf16.msrb.mxu3 %v1418_v44  ;;  %v1437_v44 = vld [vmem:[%s1934_s9 + $0x10] sm:$0xff] }
  0x5f   :  { %674 = vmatpush.bf16.msrb.mxu0 %v1426_v15 }
  0x60   :  { %575 = vmatpush.bf16.msrb.mxu1 %v1410_v41  ;;  %787 = vmatpush.bf16.msra.mxu2 %v1438_v35 }
  0x61   :  { %590 = vmatpush.bf16.msrb.mxu3 %v1417_v46  ;;  %v1435_v46 = vld [vmem:[%s1934_s9] sm:$0xff] }
  0x63   :  { %675 = vmatpush.bf16.msrb.mxu0 %v1425_v16  ;;  %v1449_v16 = vld [vmem:[#allocation11 + $0x10] sm:$0xff] }
  0x64   :  { %576 = vmatpush.bf16.msrb.mxu1 %v1409_v43  ;;  %788 = vmatpush.bf16.msra.mxu2 %v1437_v44 }
  0x65   :  { %591 = vmatpush.bf16.msrb.mxu3 %v1416_v48 }
  0x67   :  { %676 = vmatpush.bf16.msrb.mxu0 %v1424_v17  ;;  %v1448_v17 = vld [vmem:[#allocation11 + $0x8] sm:$0xff] }
  0x68   :  { %577 = vmatpush.bf16.msrb.mxu1 %v1408_v45  ;;  %v1436_v45 = vld [vmem:[%s1934_s9 + $0x8] sm:$0xff] }
  0x69   :  { %592 = vmatpush.bf16.msrb.mxu3 %v1415_v49  ;;  %789 = vmatpush.bf16.msra.mxu2 %v1436_v45  ;;  %v1474_v49 = vld [vmem:[%s1933_s8] ss:$0 sm:$0xff] }
  0x6b   :  { %677 = vmatpush.bf16.msrb.mxu0 %v1423_v18  ;;  %v1447_v18 = vld [vmem:[#allocation11] sm:$0xff] }
  0x6c   :  { %578 = vmatpush.bf16.msrb.mxu1 %v1407_v47  ;;  %v1442_v47 = vld [vmem:[%s1936_s11 + $0x18] sm:$0xff] }
  0x6d   :  { %790 = vmatpush.bf16.msra.mxu2 %v1435_v46 }
  0x70   :  { %843 = vmatpush.bf16.msra.mxu1 %v1442_v47 }
  0xcb   :  { %v386_v53 = vpop.f32.mrf.mxu0 }
  0xcc   :  { %v400_v54 = vpop.f32.mrf.mxu1  ;;  %v387_v55 = vadd.f32 %v386_v53, %v205_v52 }
  0xce   :  { %v401_v56 = vadd.f32 %v400_v54, %v387_v55 }
  0xcf   :  { %v428_v57 = vpop.f32.mrf.mxu3 }
  0xd0   :  { %v433_v63 = vmax.f32 %v401_v56, 0.0  ;;  %v1441_v56 = vld [vmem:[%s1936_s11 + $0x10] sm:$0xff] }
  0xd1   :  { %v414_v58 = vpop.f32.mrf.mxu2  ;;  %844 = vmatpush.bf16.msra.mxu1 %v1441_v56 }
  0xd2   :  { %v415_v1 = vadd.f32 %v414_v58, %v206_v59  ;;  %v1439_v58 = vld [vmem:[%s1936_s11] sm:$0xff] }
  0xd3   :  { %v388_v60 = vpop.f32.mrf.mxu0 }
  0xd4   :  { %v389_v61 = vadd.f32 %v388_v60, %v205_v52  ;;  %v402_v62 = vpop.f32.mrf.mxu1  ;;  %v429_v5 = vadd.f32 %v428_v57, %v415_v1  ;;  %v1440_v57 = vld [vmem:[%s1936_s11 + $0x8] sm:$0xff] }
  0xd5   :  { %845 = vmatpush.bf16.msra.mxu1 %v1440_v57 }
  0xd6   :  { %v403_v0 = vadd.f32 %v402_v62, %v389_v61  ;;  %v434_v9 = vmax.f32 %v429_v5, 0.0  ;;  %v1475_v61 = vld [vmem:[%s1935_s10] ss:$0 sm:$0xff]  ;;  %v1444_v5 = vld [vmem:[#allocation10 + $0x8] sm:$0xff] }
  0xd7   :  { %v430_v7 = vpop.f32.mrf.mxu3 }
  0xd8   :  { %v435_v2 = vmax.f32 %v403_v0, 0.0 }
  0xd9   :  { %v416_v4 = vpop.f32.mrf.mxu2  ;;  %846 = vmatpush.bf16.msra.mxu1 %v1439_v58 }
  0xda   :  { %v437_v3 = vpack.c.bf16 %v435_v2, %v433_v63  ;;  %v417_v6 = vadd.f32 %v416_v4, %v206_v59  ;;  %v1446_v59 = vld [vmem:[#allocation10 + $0x18] sm:$0xff]  ;;  %v1445_v4 = vld [vmem:[#allocation10 + $0x10] sm:$0xff] }
  0xdb   :  { %899 = vmatpush.bf16.msra.mxu3 %v1446_v59 }
  0xdc   :  { %579 = vmatmul.bf16.vlgmr.msrb.gmra.mxu1 %v437_v3  ;;  %v431_v8 = vadd.f32 %v430_v7, %v417_v6  ;;  %v1443_v6 = vld [vmem:[#allocation10] sm:$0xff]  ;;  %v1450_v7 = vld [vmem:[#allocation11 + $0x18] sm:$0xff] }
  0xdd   :  { %955 = vmatpush.bf16.msra.mxu0 %v1450_v7 }
  0xde   :  { %v436_v10 = vmax.f32 %v431_v8, 0.0 }
  0xdf   :  { %900 = vmatpush.bf16.msra.mxu3 %v1445_v4 }
  0xe0   :  { %v438_v11 = vpack.c.bf16 %v436_v10, %v434_v9  ;;  %v1476_v9 = vld [vmem:[%s1937_s12] ss:$0 sm:$0xff] }
  0xe1   :  { %956 = vmatpush.bf16.msra.mxu0 %v1449_v16 }
  0xe2   :  { %593 = vmatmul.bf16.vlgmr.msrb.gmra.mxu3 %v438_v11 }
  0xe3   :  { %901 = vmatpush.bf16.msra.mxu3 %v1444_v5 }
  0xe5   :  { %957 = vmatpush.bf16.msra.mxu0 %v1448_v17 }
  0xe7   :  { %902 = vmatpush.bf16.msra.mxu3 %v1443_v6 }
  0xe9   :  { %958 = vmatpush.bf16.msra.mxu0 %v1447_v18 }
 0x159   :  { %v580_v20 = vpop.f32.mrf.mxu1 }
 0x15a   :  { %v581_v24 = vadd.f32 %v1472_v22, %v580_v20 }
 0x161   :  { %v582_v23 = vpop.f32.mrf.mxu1 }
 0x162   :  { %v583_v25 = vadd.f32 %v1472_v22, %v582_v23 }
 0x165   :  { %v594_v21 = vpop.f32.mrf.mxu3 }
 0x166   :  { %v595_v26 = vadd.f32 %v594_v21, %v581_v24  ;;  %v1477_v21 = vld [vmem:[%s1939_s14] ss:$0 sm:$0xff] }
 0x168   :  { %v599_v29 = vmax.f32 %v595_v26, 0.0 }
 0x16d   :  { %v596_v27 = vpop.f32.mrf.mxu3 }
 0x16e   :  { %v597_v28 = vadd.f32 %v596_v27, %v583_v25 }
 0x170   :  { %v600_v30 = vmax.f32 %v597_v28, 0.0  ;;  %v1453_v28 = vld [vmem:[#allocation13 + $0x10] sm:$0xff] }
 0x172   :  { %v601_v31 = vpack.c.bf16 %v600_v30, %v599_v29  ;;  %v1452_v29 = vld [vmem:[#allocation13 + $0x8] sm:$0xff]  ;;  %v1451_v30 = vld [vmem:[#allocation13] sm:$0xff] }
 0x174   :  { %678 = vmatmul.bf16.vlgmr.msrb.gmra.mxu0 %v601_v31 }
 0x1f1   :  { %v679_v36 = vpop.f32.mrf.mxu0 }
 0x1f2   :  { %v680_v38 = vadd.f32 %v1473_v37, %v679_v36 }
 0x1f4   :  { %v684_v41 = vmax.f32 %v680_v38, 0.0 }
 0x1f9   :  { %v681_v39 = vpop.f32.mrf.mxu0 }
 0x1fa   :  { %v682_v40 = vadd.f32 %v1473_v37, %v681_v39 }
 0x1fc   :  { %v685_v42 = vmax.f32 %v682_v40, 0.0  ;;  %v1479_v40 = vld [vmem:[%s1960_s0] ss:$0 sm:$0xff] }
 0x1fe   :  { %v686_v43 = vpack.c.bf16 %v685_v42, %v684_v41 }
 0x200   :  { %1289 = vmatmul.msk.bf16.vlgmr.msrb.gmra.mxu2 %vm723_vm2, %v686_v43 }
 0x201   :  { %1011 = vmatpush.bf16.msrb.mxu2 %v1454_v19 }
 0x205   :  { %1012 = vmatpush.bf16.msrb.mxu2 %v1453_v28 }
 0x209   :  { %1013 = vmatpush.bf16.msrb.mxu2 %v1452_v29 }
 0x20d   :  { %1014 = vmatpush.bf16.msrb.mxu2 %v1451_v30 }
 0x283   :  { %v736_v48 = vpop.f32.mrf.mxu2 }
 0x284   :  { %v737_v50 = vadd.f32 %v1474_v49, %v736_v48 }
 0x286   :  { %v741_v53 = vmax.f32 %v737_v50, 0.0 }
 0x28b   :  { %v738_v51 = vpop.f32.mrf.mxu2 }
 0x28c   :  { %v739_v52 = vadd.f32 %v1474_v49, %v738_v51 }
 0x28e   :  { %v742_v54 = vmax.f32 %v739_v52, 0.0 }
 0x290   :  { %v743_v55 = vpack.c.bf16 %v742_v54, %v741_v53 }
 0x292   :  { %1306 = vmatmul.msk.bf16.vlgmr.msra.gmra.mxu2 %vm723_vm2, %v743_v55 }
 0x315   :  { %v792_v60 = vpop.f32.mrf.mxu2 }
 0x316   :  { %v793_v62 = vadd.f32 %v1475_v61, %v792_v60 }
 0x318   :  { %v797_v1 = vmax.f32 %v793_v62, 0.0 }
 0x31d   :  { %v794_v63 = vpop.f32.mrf.mxu2 }
 0x31e   :  { %v795_v0 = vadd.f32 %v1475_v61, %v794_v63 }
 0x320   :  { %v798_v2 = vmax.f32 %v795_v0, 0.0 }
 0x322   :  { %v799_v3 = vpack.c.bf16 %v798_v2, %v797_v1 }
 0x324   :  { %1323 = vmatmul.msk.bf16.vlgmr.msra.gmra.mxu1 %vm723_vm2, %v799_v3 }
 0x3a1   :  { %v848_v8 = vpop.f32.mrf.mxu1 }
 0x3a2   :  { %v849_v10 = vadd.f32 %v1476_v9, %v848_v8 }
 0x3a4   :  { %v853_v13 = vmax.f32 %v849_v10, 0.0 }
 0x3a9   :  { %v850_v11 = vpop.f32.mrf.mxu1 }
 0x3aa   :  { %v851_v12 = vadd.f32 %v1476_v9, %v850_v11 }
 0x3ac   :  { %v854_v14 = vmax.f32 %v851_v12, 0.0 }
 0x3ae   :  { %v855_v15 = vpack.c.bf16 %v854_v14, %v853_v13 }
 0x3b0   :  { %1340 = vmatmul.msk.bf16.vlgmr.msra.gmra.mxu3 %vm723_vm2, %v855_v15 }
 0x433   :  { %v904_v20 = vpop.f32.mrf.mxu3 }
 0x434   :  { %v905_v22 = vadd.f32 %v1477_v21, %v904_v20 }
 0x436   :  { %v909_v25 = vmax.f32 %v905_v22, 0.0 }
 0x43b   :  { %v906_v23 = vpop.f32.mrf.mxu3 }
 0x43c   :  { %v907_v24 = vadd.f32 %v1477_v21, %v906_v23 }
 0x43e   :  { %v910_v26 = vmax.f32 %v907_v24, 0.0 }
 0x440   :  { %v911_v27 = vpack.c.bf16 %v910_v26, %v909_v25 }
 0x442   :  { %1357 = vmatmul.msk.bf16.vlgmr.msra.gmra.mxu0 %vm723_vm2, %v911_v27 }
 0x4bf   :  { %v960_v31 = vpop.f32.mrf.mxu0 }
 0x4c0   :  { %v961_v33 = vadd.f32 %v1478_v32, %v960_v31 }
 0x4c2   :  { %v965_v36 = vmax.f32 %v961_v33, 0.0 }
 0x4c7   :  { %v962_v34 = vpop.f32.mrf.mxu0 }
 0x4c8   :  { %v963_v35 = vadd.f32 %v1478_v32, %v962_v34 }
 0x4ca   :  { %v966_v37 = vmax.f32 %v963_v35, 0.0 }
 0x4cc   :  { %v967_v38 = vpack.c.bf16 %v966_v37, %v965_v36 }
 0x4ce   :  { %1374 = vmatmul.msk.bf16.vlgmr.msrb.gmra.mxu2 %vm723_vm2, %v967_v38 }
 0x551   :  { %v1016_v39 = vpop.f32.mrf.mxu2 }
 0x552   :  { %v1017_v42 = vadd.f32 %v1479_v40, %v1016_v39 }
 0x559   :  { %v1018_v41 = vpop.f32.mrf.mxu2 }
 0x55a   :  { %v1019_v43 = vadd.f32 %v1479_v40, %v1018_v41 }
 0x55c   :  { %v1458_v44 = vpack.c.bf16 %v1019_v43, %v1017_v42 }
 0x55e   :  { %1459 = vst [vmem:[#allocation14] sm:$0xff] %v1458_v44  }
 0x55f   :  { %1037 = dma.vmem_to_hbm [thread:$0]  %s1030_s7, 128, %s1032_s6, [#allocation4], %s1958_s16, %s1958_s16, %s1687_s19  }
 0x560   :  { %1680 = dma.done.wait [#allocation4], 128  }
 0x561   :  { %1681 = vsyncadd [#allocation4], 4294967168 }
 0x562   :  { %1042 = vsyncpa [#allocation3], 1 }
 0x563   :  { %1043 = vsyncpa [#allocation6], 1 }
 0x564   :  { %1044 = vsyncpa [#allocation9], 1 }
 0x565   :  { %1045 = vsyncpa [#allocation12], 1 }
 0x566   :  { %1046 = vsyncpa [#allocation4], 1 }

</bundles_post_ra>
